<compile_context>
chip_gen: v6e
topology: v6e:2x2x1
jax: 0.10.0
libtpu: 0.0.40
codegen_flags: <defaults>
</compile_context>

<pallas_src>
import functools
import numpy as np
import jax
import jax.numpy as jnp
from jax.experimental import pallas as pl
from jax.experimental.pallas import tpu as pltpu

# ----------------------- small hyper-parameters (original values in comments) ---------
VOCAB = 40          # len(symbols) + 1      (symbols not provided)
EMB = 32            # embedding_size        (256)
GRU_H = 48          # GRU_hidden_size       (768)
PRENET_H = 64       # bert_prenet_hidden    (1024)
PRENET_OUT = 32     # bert_prenet_output    (256) == position-embedding dim
BERT_H = 32         # bert_hidden           (256)
BERT_LAYERS = 2     # bert_n_layers
BERT_HEADS = 4      # bert_attn_heads
BERT_FF = 4 * BERT_H
POS_TABLE = 64      # vocab_max_size        (2000)

VMEM = pltpu.MemorySpace.VMEM


# ===================================== kernels ========================================
def _gru_kernel(xf_ref, xb_ref, len_ref,
                wif_ref, bif_ref, whf_ref, bhf_ref,
                wib_ref, bib_ref, whb_ref, bhb_ref,
                o_ref, *, l_max, n_rows, hidden):
    """Bidirectional GRU word embeddings for ALL word segments in one kernel.

    xf_ref / xb_ref : (l_max * n_rows, EMB) — forward / time-reversed padded segments,
                      time-major (rows [t*n_rows:(t+1)*n_rows] are timestep t),
                      n_rows = n_segments rounded up to a multiple of 8.
    len_ref         : (n_rows, 1) int32 segment lengths (0 for padded rows).
    w*/b*           : per-gate weights stacked on a leading gate axis [r|z|n]:
                      Wi (3, EMB, H), bi (3, 1, H), Wh (3, H, H), bh (3, 1, H),
                      one set per direction.
    o_ref           : (n_rows, H) = h_f(0)+h_f(last) + h_b(0)+h_b(last)
                      (== get_GRU_embedding of the reference).
    """
    H = hidden
    lens = len_ref[...]                                   # (n_rows, 1) int32

    def run_direction(x_ref, wi_ref, bi_ref, wh_ref, bh_ref):
        x = x_ref[...]                                    # (l_max*n_rows, EMB)
        # Hoisted input projections: one big matmul per gate over all timesteps.
        # The r/z recurrence biases are folded in once (PyTorch GRU:
        #   r = sigmoid(Wir x + bir + Whr h + bhr), same for z).
        gi_r = (jnp.dot(x, wi_ref[0], preferred_element_type=jnp.float32)
                + bi_ref[0] + bh_ref[0])
        gi_z = (jnp.dot(x, wi_ref[1], preferred_element_type=jnp.float32)
                + bi_ref[1] + bh_ref[1])
        gi_n = (jnp.dot(x, wi_ref[2], preferred_element_type=jnp.float32)
                + bi_ref[2])
        wh_r = wh_ref[0]
        wh_z = wh_ref[1]
        wh_n = wh_ref[2]
        bh_n = jnp.broadcast_to(bh_ref[2], (n_rows, H))   # hoisted broadcast

        h = jnp.zeros((n_rows, H), jnp.float32)
        h_first = h
        # Fully unrolled: l_max is tiny at these sizes.
        for t in range(l_max):
            r0 = t * n_rows                               # 8-aligned row offset
            gh_r = jnp.dot(h, wh_r, preferred_element_type=jnp.float32)
            gh_z = jnp.dot(h, wh_z, preferred_element_type=jnp.float32)
            gh_n = jnp.dot(h, wh_n, preferred_element_type=jnp.float32) + bh_n
            r = jax.nn.sigmoid(gi_r[r0:r0 + n_rows] + gh_r)
            z = jax.nn.sigmoid(gi_z[r0:r0 + n_rows] + gh_z)
            n = jnp.tanh(gi_n[r0:r0 + n_rows] + r * gh_n)
            h_new = (1.0 - z) * n + z * h
            h = jnp.where(lens > t, h_new, h)             # freeze padded steps / rows
            if t == 0:
                h_first = h
        return h_first + h                                # h(t=0) + h(t=last)

    fwd = run_direction(xf_ref, wif_ref, bif_ref, whf_ref, bhf_ref)
    bwd = run_direction(xb_ref, wib_ref, bib_ref, whb_ref, bhb_ref)
    o_ref[...] = fwd + bwd


def gru_words(gp, x_f, x_b, lens, l_max, n_rows):
    return pl.pallas_call(
        functools.partial(_gru_kernel, l_max=l_max, n_rows=n_rows, hidden=GRU_H),
        out_shape=jax.ShapeDtypeStruct((n_rows, GRU_H), jnp.float32),
        in_specs=[pl.BlockSpec(memory_space=VMEM)] * 11,
        out_specs=pl.BlockSpec(memory_space=VMEM),
    )(x_f, x_b, lens,
      gp["fwd"]["Wi"], gp["fwd"]["bi"], gp["fwd"]["Wh"], gp["fwd"]["bh"],
      gp["bwd"]["Wi"], gp["bwd"]["bi"], gp["bwd"]["Wh"], gp["bwd"]["bh"])


def _ln(x, g, b, eps):
    mu = jnp.mean(x, axis=-1, keepdims=True)
    var = jnp.mean(jnp.square(x - mu), axis=-1, keepdims=True)
    return (x - mu) * jax.lax.rsqrt(var + eps) * g + b


def _prenet_bert_kernel(*refs, heads, hidden, n_layers, eps):
    """Fused bert_pre_net + position add + all BERT layers.

    refs = [x (B*S, GRU_H), pos (B*S, C), bias (B*S, B*S),
            prenet W1,b1,W2,b2,
            per layer: ln1g,ln1b,Wq,bq,Wk,bk,Wv,bv,Wo,bo,ln2g,ln2b,W1,b1,W2,b2,
            out (B*S, C)]
    `bias` is an additive attention bias: 0 inside a batch's valid-key block,
    -1e9 elsewhere (cross-batch + padded keys), so one (B*S, B*S) score matmul per
    head computes all batches at once with correct key-padding masking.
    Dropout = identity (eval mode).
    """
    x_ref, pos_ref, bias_ref, pw1_ref, pb1_ref, pw2_ref, pb2_ref = refs[:7]
    o_ref = refs[-1]
    layer_refs = refs[7:-1]

    hd = hidden // heads
    scale = 1.0 / float(hd) ** 0.5
    bias = bias_ref[...]                                  # (B*S, B*S)

    # ----- bert_pre_net (Linear-ReLU-Linear) + sinusoid position add -----
    h = jnp.dot(x_ref[...], pw1_ref[...], preferred_element_type=jnp.float32) + pb1_ref[...]
    h = jnp.maximum(h, 0.0)
    x = jnp.dot(h, pw2_ref[...], preferred_element_type=jnp.float32) + pb2_ref[...] + pos_ref[...]

    # ----- pre-norm BERT transformer blocks -----
    for li in range(n_layers):
        (ln1g, ln1b, wq, bq, wk, bk, wv, bv, wo, bo,
         ln2g, ln2b, fw1, fb1, fw2, fb2) = layer_refs[li * 16:(li + 1) * 16]

        # attention sublayer
        hn = _ln(x, ln1g[...], ln1b[...], eps)
        q = (jnp.dot(hn, wq[...], preferred_element_type=jnp.float32) + bq[...]) * scale
        k = jnp.dot(hn, wk[...], preferred_element_type=jnp.float32) + bk[...]
        v = jnp.dot(hn, wv[...], preferred_element_type=jnp.float32) + bv[...]

        cols = []
        for hh in range(heads):                           # unrolled over 4 heads
            c0 = hh * hd
            qh = q[:, c0:c0 + hd]
            kh = k[:, c0:c0 + hd]
            vh = v[:, c0:c0 + hd]
            s = jax.lax.dot_general(qh, kh, (((1,), (1,)), ((), ())),
                                    preferred_element_type=jnp.float32)  # (B*S, B*S)
            s = s + bias
            s = s - jnp.max(s, axis=-1, keepdims=True)
            p = jnp.exp(s)
            p = p / jnp.sum(p, axis=-1, keepdims=True)    # exact divide (parity)
            cols.append(jnp.dot(p, vh, preferred_element_type=jnp.float32))
        attn = jnp.concatenate(cols, axis=1)              # (B*S, C)
        x = x + jnp.dot(attn, wo[...], preferred_element_type=jnp.float32) + bo[...]

        # feed-forward sublayer
        hn = _ln(x, ln2g[...], ln2b[...], eps)
        f = jnp.dot(hn, fw1[...], preferred_element_type=jnp.float32) + fb1[...]
        # tanh-approx GELU (the GELU used by the BERT-pytorch reference implementation)
        f = 0.5 * f * (1.0 + jnp.tanh(0.7978845608028654 * (f + 0.044715 * f * f * f)))
        x = x + jnp.dot(f, fw2[...], preferred_element_type=jnp.float32) + fb2[...]

    o_ref[...] = x


def prenet_bert_apply(params, x_flat, pos_flat, attn_bias):
    pp = params["prenet"]
    args = [x_flat, pos_flat, attn_bias, pp["W1"], pp["b1"], pp["W2"], pp["b2"]]
    for lp in params["bert_layers"]:
        args += [lp["ln1_g"], lp["ln1_b"], lp["Wq"], lp["bq"], lp["Wk"], lp["bk"],
                 lp["Wv"], lp["bv"], lp["Wo"], lp["bo"],
                 lp["ln2_g"], lp["ln2_b"], lp["W1"], lp["b1"], lp["W2"], lp["b2"]]
    return pl.pallas_call(
        functools.partial(_prenet_bert_kernel, heads=BERT_HEADS, hidden=BERT_H,
                          n_layers=BERT_LAYERS, eps=1e-5),
        out_shape=jax.ShapeDtypeStruct((x_flat.shape[0], BERT_H), jnp.float32),
        in_specs=[pl.BlockSpec(memory_space=VMEM)] * len(args),
        out_specs=pl.BlockSpec(memory_space=VMEM),
    )(*args)


# ===================================== glue ===========================================
def sinusoid_table(n_position, d_hid):
    pos = np.arange(n_position)[:, None].astype(np.float64)
    idx = np.arange(d_hid)[None, :]
    angle = pos / np.power(10000.0, 2.0 * (idx // 2) / float(d_hid))
    table = np.zeros((n_position, d_hid), dtype=np.float64)
    table[:, 0::2] = np.sin(angle[:, 0::2])
    table[:, 1::2] = np.cos(angle[:, 1::2])
    return jnp.asarray(table, dtype=jnp.float32)


def wess_encoder_forward(params, x_tokens, bert_embeddings, gate_for_words, indexs_list=None):
    B, L = x_tokens.shape
    emb = jnp.take(params["pre_embedding"], x_tokens, axis=0)           # (B, L, EMB)
    encoder_output_alpha = emb
    emb_flat = emb.reshape(B * L, EMB)

    # ---- trace-time (numpy) index plumbing for word segments (host indices, as in ref) ----
    seg_info, words_per_batch = [], []
    for b in range(B):
        gates = gate_for_words[b]
        words_per_batch.append(len(gates) - 1)
        for i in range(len(gates) - 1):
            seg_info.append((b, gates[i], gates[i + 1] - gates[i]))     # (batch, start, len)
    n_seg = len(seg_info)
    l_max = max(ln for _, _, ln in seg_info)
    n_rows = ((n_seg + 7) // 8) * 8                                     # sublane-aligned rows

    idx_f = np.zeros((l_max, n_rows), np.int32)
    idx_b = np.zeros((l_max, n_rows), np.int32)
    lens_np = np.zeros((n_rows, 1), np.int32)
    for s, (b, st, ln) in enumerate(seg_info):
        lens_np[s, 0] = ln
        for t in range(l_max):
            tf = min(t, ln - 1)                                         # clamp padded steps
            idx_f[t, s] = b * L + st + tf
            idx_b[t, s] = b * L + st + (ln - 1 - tf)
    x_f = jnp.take(emb_flat, jnp.asarray(idx_f.reshape(-1)), axis=0)    # (l_max*n_rows, EMB)
    x_b = jnp.take(emb_flat, jnp.asarray(idx_b.reshape(-1)), axis=0)
    lens = jnp.asarray(lens_np)

    # single fused GRU kernel over all segments & both directions
    words_all = gru_words(params["gru"], x_f, x_b, lens, l_max, n_rows)  # (n_rows, GRU_H)

    # ---- pad_bert_embedding_and_GRU_embedding + add + pad_all (gather-based glue) ----
    bert_lens = [be.shape[0] for be in bert_embeddings]
    per_batch_len = [max(bl, wc) for bl, wc in zip(bert_lens, words_per_batch)]
    S = max(per_batch_len)

    bert_padded = jnp.stack([jnp.pad(be, ((0, S - be.shape[0]), (0, 0)))
                             for be in bert_embeddings])                 # (B, S, GRU_H)

    word_map = np.zeros((B, S), np.int32)
    word_valid = np.zeros((B, S, 1), np.float32)
    off = 0
    for b in range(B):
        for j in range(words_per_batch[b]):
            word_map[b, j] = off + j
            word_valid[b, j, 0] = 1.0
        off += words_per_batch[b]
    gru_padded = (jnp.take(words_all, jnp.asarray(word_map.reshape(-1)), axis=0)
                  .reshape(B, S, GRU_H) * jnp.asarray(word_valid))
    bert_in = (bert_padded + gru_padded).reshape(B * S, GRU_H)

    # sinusoid position embedding lookup (table built with dim PRENET_OUT; in the
    # reference both are embedding_size=256 so they coincide)
    pos = jnp.broadcast_to(params["position_table"][:S][None],
                           (B, S, PRENET_OUT)).reshape(B * S, PRENET_OUT)

    # additive attention bias: block-diagonal over batches + key-padding mask
    bias_np = np.full((B * S, B * S), -1e9, np.float32)
    for b in range(B):
        bias_np[b * S:(b + 1) * S, b * S:b * S + per_batch_len[b]] = 0.0
    attn_bias = jnp.asarray(bias_np)

    # one fused kernel: prenet + position add + both BERT layers
    x_flat = prenet_bert_apply(params, bert_in, pos, attn_bias)

    encoder_output_word = x_flat.reshape(B, S, BERT_H)
    return encoder_output_word, encoder_output_alpha


# ================================= parameter init =====================================
def init_params(key):
    keys = iter(jax.random.split(key, 64))

    def rnd(shape, scale=0.05):
        return scale * jax.random.normal(next(keys), shape, dtype=jnp.float32)

    def gru_dir():
        # per-gate weights stacked on leading gate axis [r | z | n] -> lane-aligned gates
        return {
            "Wi": rnd((3, EMB, GRU_H)), "bi": rnd((3, 1, GRU_H)),
            "Wh": rnd((3, GRU_H, GRU_H)), "bh": rnd((3, 1, GRU_H)),
        }

    # NOTE: weights kept f32 for numeric parity at toy dims; use bf16 at production dims.
    params = {
        "pre_embedding": rnd((VOCAB, EMB), 0.1),
        "position_table": sinusoid_table(POS_TABLE, PRENET_OUT),
        "gru": {"fwd": gru_dir(), "bwd": gru_dir()},
        "prenet": {
            "W1": rnd((GRU_H, PRENET_H)), "b1": jnp.zeros((1, PRENET_H), jnp.float32),
            "W2": rnd((PRENET_H, PRENET_OUT)), "b2": jnp.zeros((1, PRENET_OUT), jnp.float32),
        },
        "bert_layers": [],
    }
    for _ in range(BERT_LAYERS):
        params["bert_layers"].append({
            "ln1_g": jnp.ones((1, BERT_H), jnp.float32), "ln1_b": jnp.zeros((1, BERT_H), jnp.float32),
            "Wq": rnd((BERT_H, BERT_H)), "bq": jnp.zeros((1, BERT_H), jnp.float32),
            "Wk": rnd((BERT_H, BERT_H)), "bk": jnp.zeros((1, BERT_H), jnp.float32),
            "Wv": rnd((BERT_H, BERT_H)), "bv": jnp.zeros((1, BERT_H), jnp.float32),
            "Wo": rnd((BERT_H, BERT_H)), "bo": jnp.zeros((1, BERT_H), jnp.float32),
            "ln2_g": jnp.ones((1, BERT_H), jnp.float32), "ln2_b": jnp.zeros((1, BERT_H), jnp.float32),
            "W1": rnd((BERT_H, BERT_FF)), "b1": jnp.zeros((1, BERT_FF), jnp.float32),
            "W2": rnd((BERT_FF, BERT_H)), "b2": jnp.zeros((1, BERT_H), jnp.float32),
        })
    return params


# ====================================== main ==========================================
if __name__ == "__main__":
    key = jax.random.PRNGKey(0)
    pkey, xkey, b0key, b1key = jax.random.split(key, 4)
    params = init_params(pkey)

    B, L = 2, 12
    x = jax.random.randint(xkey, (B, L), 0, VOCAB, dtype=jnp.int32)
    # word-boundary gates (host-side python indices, as in the reference code)
    gate_for_words = [[0, 4, 8, 12], [0, 3, 7, 12]]
    # per-batch BERT embeddings with (possibly) different word counts, dim == GRU_H
    bert_embeddings = [
        0.1 * jax.random.normal(b0key, (4, GRU_H), dtype=jnp.float32),
        0.1 * jax.random.normal(b1key, (3, GRU_H), dtype=jnp.float32),
    ]

    word, alpha = wess_encoder_forward(params, x, bert_embeddings, gate_for_words, indexs_list=None)
    word = jax.block_until_ready(word)
    alpha = jax.block_until_ready(alpha)

    assert word.shape == (B, 4, BERT_H), word.shape     # encoder_output_word
    assert alpha.shape == (B, L, EMB), alpha.shape      # encoder_output_alpha
    assert bool(jnp.isfinite(word).all()) and bool(jnp.isfinite(alpha).all())
    print("KERNEL_OK")
</pallas_src>

<mosaic_0001>
module attributes {stable_mosaic.version = 11 : i64} {
  func.func @_gru_kernel(%arg0: memref<40x32xf32, #tpu.memory_space<vmem>>, %arg1: memref<40x32xf32, #tpu.memory_space<vmem>>, %arg2: memref<8x1xi32, #tpu.memory_space<vmem>>, %arg3: memref<3x32x48xf32, #tpu.memory_space<vmem>>, %arg4: memref<3x1x48xf32, #tpu.memory_space<vmem>>, %arg5: memref<3x48x48xf32, #tpu.memory_space<vmem>>, %arg6: memref<3x1x48xf32, #tpu.memory_space<vmem>>, %arg7: memref<3x32x48xf32, #tpu.memory_space<vmem>>, %arg8: memref<3x1x48xf32, #tpu.memory_space<vmem>>, %arg9: memref<3x48x48xf32, #tpu.memory_space<vmem>>, %arg10: memref<3x1x48xf32, #tpu.memory_space<vmem>>, %arg11: memref<8x48xf32, #tpu.memory_space<vmem>>) attributes {dimension_semantics = [], scalar_prefetch = 0 : i64, scratch_operands = 0 : i64, tpu.core_type = #tpu.core_type<tc>} {
    %c0 = arith.constant 0 : index
    %c0_0 = arith.constant 0 : index
    %0 = vector.load %arg2[%c0, %c0_0] : memref<8x1xi32, #tpu.memory_space<vmem>>, vector<8x1xi32>
    %c0_1 = arith.constant 0 : index
    %c0_2 = arith.constant 0 : index
    %1 = vector.load %arg0[%c0_1, %c0_2] : memref<40x32xf32, #tpu.memory_space<vmem>>, vector<40x32xf32>
    %c0_3 = arith.constant 0 : index
    %c0_4 = arith.constant 0 : index
    %c0_5 = arith.constant 0 : index
    %2 = vector.load %arg3[%c0_3, %c0_4, %c0_5] : memref<3x32x48xf32, #tpu.memory_space<vmem>>, vector<1x32x48xf32>
    %3 = vector.shape_cast %2 : vector<1x32x48xf32> to vector<32x48xf32>
    %cst = arith.constant dense<0.000000e+00> : vector<40x48xf32>
    %4 = tpu.matmul %1, %3, %cst {dimension_numbers = #tpu.dot_dimension_numbers<[1], [0], [0], [1], [0, 0, 1, 1], [], []>} : vector<40x32xf32>, vector<32x48xf32>, vector<40x48xf32> -> vector<40x48xf32>
    %c0_6 = arith.constant 0 : index
    %c0_7 = arith.constant 0 : index
    %c0_8 = arith.constant 0 : index
    %5 = vector.load %arg4[%c0_6, %c0_7, %c0_8] : memref<3x1x48xf32, #tpu.memory_space<vmem>>, vector<1x1x48xf32>
    %6 = vector.shape_cast %5 : vector<1x1x48xf32> to vector<1x48xf32>
    %7 = vector.broadcast %6 : vector<1x48xf32> to vector<40x48xf32>
    %8 = arith.addf %4, %7 : vector<40x48xf32>
    %c0_9 = arith.constant 0 : index
    %c0_10 = arith.constant 0 : index
    %c0_11 = arith.constant 0 : index
    %9 = vector.load %arg6[%c0_9, %c0_10, %c0_11] : memref<3x1x48xf32, #tpu.memory_space<vmem>>, vector<1x1x48xf32>
    %10 = vector.shape_cast %9 : vector<1x1x48xf32> to vector<1x48xf32>
    %11 = vector.broadcast %10 : vector<1x48xf32> to vector<40x48xf32>
    %12 = arith.addf %8, %11 : vector<40x48xf32>
    %c1 = arith.constant 1 : index
    %c0_12 = arith.constant 0 : index
    %c0_13 = arith.constant 0 : index
    %13 = vector.load %arg3[%c1, %c0_12, %c0_13] : memref<3x32x48xf32, #tpu.memory_space<vmem>>, vector<1x32x48xf32>
    %14 = vector.shape_cast %13 : vector<1x32x48xf32> to vector<32x48xf32>
    %cst_14 = arith.constant dense<0.000000e+00> : vector<40x48xf32>
    %15 = tpu.matmul %1, %14, %cst_14 {dimension_numbers = #tpu.dot_dimension_numbers<[1], [0], [0], [1], [0, 0, 1, 1], [], []>} : vector<40x32xf32>, vector<32x48xf32>, vector<40x48xf32> -> vector<40x48xf32>
    %c1_15 = arith.constant 1 : index
    %c0_16 = arith.constant 0 : index
    %c0_17 = arith.constant 0 : index
    %16 = vector.load %arg4[%c1_15, %c0_16, %c0_17] : memref<3x1x48xf32, #tpu.memory_space<vmem>>, vector<1x1x48xf32>
    %17 = vector.shape_cast %16 : vector<1x1x48xf32> to vector<1x48xf32>
    %18 = vector.broadcast %17 : vector<1x48xf32> to vector<40x48xf32>
    %19 = arith.addf %15, %18 : vector<40x48xf32>
    %c1_18 = arith.constant 1 : index
    %c0_19 = arith.constant 0 : index
    %c0_20 = arith.constant 0 : index
    %20 = vector.load %arg6[%c1_18, %c0_19, %c0_20] : memref<3x1x48xf32, #tpu.memory_space<vmem>>, vector<1x1x48xf32>
    %21 = vector.shape_cast %20 : vector<1x1x48xf32> to vector<1x48xf32>
    %22 = vector.broadcast %21 : vector<1x48xf32> to vector<40x48xf32>
    %23 = arith.addf %19, %22 : vector<40x48xf32>
    %c2 = arith.constant 2 : index
    %c0_21 = arith.constant 0 : index
    %c0_22 = arith.constant 0 : index
    %24 = vector.load %arg3[%c2, %c0_21, %c0_22] : memref<3x32x48xf32, #tpu.memory_space<vmem>>, vector<1x32x48xf32>
    %25 = vector.shape_cast %24 : vector<1x32x48xf32> to vector<32x48xf32>
    %cst_23 = arith.constant dense<0.000000e+00> : vector<40x48xf32>
    %26 = tpu.matmul %1, %25, %cst_23 {dimension_numbers = #tpu.dot_dimension_numbers<[1], [0], [0], [1], [0, 0, 1, 1], [], []>} : vector<40x32xf32>, vector<32x48xf32>, vector<40x48xf32> -> vector<40x48xf32>
    %c2_24 = arith.constant 2 : index
    %c0_25 = arith.constant 0 : index
    %c0_26 = arith.constant 0 : index
    %27 = vector.load %arg4[%c2_24, %c0_25, %c0_26] : memref<3x1x48xf32, #tpu.memory_space<vmem>>, vector<1x1x48xf32>
    %28 = vector.shape_cast %27 : vector<1x1x48xf32> to vector<1x48xf32>
    %29 = vector.broadcast %28 : vector<1x48xf32> to vector<40x48xf32>
    %30 = arith.addf %26, %29 : vector<40x48xf32>
    %c0_27 = arith.constant 0 : index
    %c0_28 = arith.constant 0 : index
    %c0_29 = arith.constant 0 : index
    %31 = vector.load %arg5[%c0_27, %c0_28, %c0_29] : memref<3x48x48xf32, #tpu.memory_space<vmem>>, vector<1x48x48xf32>
    %32 = vector.shape_cast %31 : vector<1x48x48xf32> to vector<48x48xf32>
    %c1_30 = arith.constant 1 : index
    %c0_31 = arith.constant 0 : index
    %c0_32 = arith.constant 0 : index
    %33 = vector.load %arg5[%c1_30, %c0_31, %c0_32] : memref<3x48x48xf32, #tpu.memory_space<vmem>>, vector<1x48x48xf32>
    %34 = vector.shape_cast %33 : vector<1x48x48xf32> to vector<48x48xf32>
    %c2_33 = arith.constant 2 : index
    %c0_34 = arith.constant 0 : index
    %c0_35 = arith.constant 0 : index
    %35 = vector.load %arg5[%c2_33, %c0_34, %c0_35] : memref<3x48x48xf32, #tpu.memory_space<vmem>>, vector<1x48x48xf32>
    %36 = vector.shape_cast %35 : vector<1x48x48xf32> to vector<48x48xf32>
    %c2_36 = arith.constant 2 : index
    %c0_37 = arith.constant 0 : index
    %c0_38 = arith.constant 0 : index
    %37 = vector.load %arg6[%c2_36, %c0_37, %c0_38] : memref<3x1x48xf32, #tpu.memory_space<vmem>>, vector<1x1x48xf32>
    %38 = vector.shape_cast %37 : vector<1x1x48xf32> to vector<1x48xf32>
    %39 = vector.shape_cast %38 : vector<1x48xf32> to vector<1x48xf32>
    %40 = vector.broadcast %39 : vector<1x48xf32> to vector<8x48xf32>
    %cst_39 = arith.constant 0.000000e+00 : f32
    %41 = vector.broadcast %cst_39 : f32 to vector<8x48xf32>
    %cst_40 = arith.constant dense<0.000000e+00> : vector<8x48xf32>
    %42 = tpu.matmul %41, %32, %cst_40 {dimension_numbers = #tpu.dot_dimension_numbers<[1], [0], [0], [1], [0, 0, 1, 1], [], []>} : vector<8x48xf32>, vector<48x48xf32>, vector<8x48xf32> -> vector<8x48xf32>
    %cst_41 = arith.constant dense<0.000000e+00> : vector<8x48xf32>
    %43 = tpu.matmul %41, %34, %cst_41 {dimension_numbers = #tpu.dot_dimension_numbers<[1], [0], [0], [1], [0, 0, 1, 1], [], []>} : vector<8x48xf32>, vector<48x48xf32>, vector<8x48xf32> -> vector<8x48xf32>
    %cst_42 = arith.constant dense<0.000000e+00> : vector<8x48xf32>
    %44 = tpu.matmul %41, %36, %cst_42 {dimension_numbers = #tpu.dot_dimension_numbers<[1], [0], [0], [1], [0, 0, 1, 1], [], []>} : vector<8x48xf32>, vector<48x48xf32>, vector<8x48xf32> -> vector<8x48xf32>
    %45 = arith.addf %44, %40 : vector<8x48xf32>
    %46 = vector.extract_strided_slice %12 {offsets = [0, 0], sizes = [8, 48], strides = [1, 1]} : vector<40x48xf32> to vector<8x48xf32>
    %47 = arith.addf %46, %42 : vector<8x48xf32>
    %48 = arith.negf %47 : vector<8x48xf32>
    %49 = math.exp %48 : vector<8x48xf32>
    %cst_43 = arith.constant 1.000000e+00 : f32
    %50 = vector.broadcast %cst_43 : f32 to vector<8x48xf32>
    %51 = arith.addf %50, %49 : vector<8x48xf32>
    %52 = arith.divf %50, %51 : vector<8x48xf32>
    %53 = vector.extract_strided_slice %23 {offsets = [0, 0], sizes = [8, 48], strides = [1, 1]} : vector<40x48xf32> to vector<8x48xf32>
    %54 = arith.addf %53, %43 : vector<8x48xf32>
    %55 = arith.negf %54 : vector<8x48xf32>
    %56 = math.exp %55 : vector<8x48xf32>
    %cst_44 = arith.constant 1.000000e+00 : f32
    %57 = vector.broadcast %cst_44 : f32 to vector<8x48xf32>
    %58 = arith.addf %57, %56 : vector<8x48xf32>
    %59 = arith.divf %57, %58 : vector<8x48xf32>
    %60 = vector.extract_strided_slice %30 {offsets = [0, 0], sizes = [8, 48], strides = [1, 1]} : vector<40x48xf32> to vector<8x48xf32>
    %61 = arith.mulf %52, %45 : vector<8x48xf32>
    %62 = arith.addf %60, %61 : vector<8x48xf32>
    %63 = math.tanh %62 : vector<8x48xf32>
    %cst_45 = arith.constant 1.000000e+00 : f32
    %64 = vector.broadcast %cst_45 : f32 to vector<8x48xf32>
    %65 = arith.subf %64, %59 : vector<8x48xf32>
    %66 = arith.mulf %65, %63 : vector<8x48xf32>
    %67 = arith.mulf %59, %41 : vector<8x48xf32>
    %68 = arith.addf %66, %67 : vector<8x48xf32>
    %c0_i32 = arith.constant 0 : i32
    %69 = vector.broadcast %c0_i32 : i32 to vector<8x1xi32>
    %70 = arith.cmpi sgt, %0, %69 : vector<8x1xi32>
    %71 = vector.shape_cast %70 : vector<8x1xi1> to vector<8x1xi1>
    %72 = vector.broadcast %71 : vector<8x1xi1> to vector<8x48xi1>
    %73 = arith.select %72, %68, %41 : vector<8x48xi1>, vector<8x48xf32>
    %cst_46 = arith.constant dense<0.000000e+00> : vector<8x48xf32>
    %74 = tpu.matmul %73, %32, %cst_46 {dimension_numbers = #tpu.dot_dimension_numbers<[1], [0], [0], [1], [0, 0, 1, 1], [], []>} : vector<8x48xf32>, vector<48x48xf32>, vector<8x48xf32> -> vector<8x48xf32>
    %cst_47 = arith.constant dense<0.000000e+00> : vector<8x48xf32>
    %75 = tpu.matmul %73, %34, %cst_47 {dimension_numbers = #tpu.dot_dimension_numbers<[1], [0], [0], [1], [0, 0, 1, 1], [], []>} : vector<8x48xf32>, vector<48x48xf32>, vector<8x48xf32> -> vector<8x48xf32>
    %cst_48 = arith.constant dense<0.000000e+00> : vector<8x48xf32>
    %76 = tpu.matmul %73, %36, %cst_48 {dimension_numbers = #tpu.dot_dimension_numbers<[1], [0], [0], [1], [0, 0, 1, 1], [], []>} : vector<8x48xf32>, vector<48x48xf32>, vector<8x48xf32> -> vector<8x48xf32>
    %77 = arith.addf %76, %40 : vector<8x48xf32>
    %78 = vector.extract_strided_slice %12 {offsets = [8, 0], sizes = [8, 48], strides = [1, 1]} : vector<40x48xf32> to vector<8x48xf32>
    %79 = arith.addf %78, %74 : vector<8x48xf32>
    %80 = arith.negf %79 : vector<8x48xf32>
    %81 = math.exp %80 : vector<8x48xf32>
    %cst_49 = arith.constant 1.000000e+00 : f32
    %82 = vector.broadcast %cst_49 : f32 to vector<8x48xf32>
    %83 = arith.addf %82, %81 : vector<8x48xf32>
    %84 = arith.divf %82, %83 : vector<8x48xf32>
    %85 = vector.extract_strided_slice %23 {offsets = [8, 0], sizes = [8, 48], strides = [1, 1]} : vector<40x48xf32> to vector<8x48xf32>
    %86 = arith.addf %85, %75 : vector<8x48xf32>
    %87 = arith.negf %86 : vector<8x48xf32>
    %88 = math.exp %87 : vector<8x48xf32>
    %cst_50 = arith.constant 1.000000e+00 : f32
    %89 = vector.broadcast %cst_50 : f32 to vector<8x48xf32>
    %90 = arith.addf %89, %88 : vector<8x48xf32>
    %91 = arith.divf %89, %90 : vector<8x48xf32>
    %92 = vector.extract_strided_slice %30 {offsets = [8, 0], sizes = [8, 48], strides = [1, 1]} : vector<40x48xf32> to vector<8x48xf32>
    %93 = arith.mulf %84, %77 : vector<8x48xf32>
    %94 = arith.addf %92, %93 : vector<8x48xf32>
    %95 = math.tanh %94 : vector<8x48xf32>
    %cst_51 = arith.constant 1.000000e+00 : f32
    %96 = vector.broadcast %cst_51 : f32 to vector<8x48xf32>
    %97 = arith.subf %96, %91 : vector<8x48xf32>
    %98 = arith.mulf %97, %95 : vector<8x48xf32>
    %99 = arith.mulf %91, %73 : vector<8x48xf32>
    %100 = arith.addf %98, %99 : vector<8x48xf32>
    %c1_i32 = arith.constant 1 : i32
    %101 = vector.broadcast %c1_i32 : i32 to vector<8x1xi32>
    %102 = arith.cmpi sgt, %0, %101 : vector<8x1xi32>
    %103 = vector.shape_cast %102 : vector<8x1xi1> to vector<8x1xi1>
    %104 = vector.broadcast %103 : vector<8x1xi1> to vector<8x48xi1>
    %105 = arith.select %104, %100, %73 : vector<8x48xi1>, vector<8x48xf32>
    %cst_52 = arith.constant dense<0.000000e+00> : vector<8x48xf32>
    %106 = tpu.matmul %105, %32, %cst_52 {dimension_numbers = #tpu.dot_dimension_numbers<[1], [0], [0], [1], [0, 0, 1, 1], [], []>} : vector<8x48xf32>, vector<48x48xf32>, vector<8x48xf32> -> vector<8x48xf32>
    %cst_53 = arith.constant dense<0.000000e+00> : vector<8x48xf32>
    %107 = tpu.matmul %105, %34, %cst_53 {dimension_numbers = #tpu.dot_dimension_numbers<[1], [0], [0], [1], [0, 0, 1, 1], [], []>} : vector<8x48xf32>, vector<48x48xf32>, vector<8x48xf32> -> vector<8x48xf32>
    %cst_54 = arith.constant dense<0.000000e+00> : vector<8x48xf32>
    %108 = tpu.matmul %105, %36, %cst_54 {dimension_numbers = #tpu.dot_dimension_numbers<[1], [0], [0], [1], [0, 0, 1, 1], [], []>} : vector<8x48xf32>, vector<48x48xf32>, vector<8x48xf32> -> vector<8x48xf32>
    %109 = arith.addf %108, %40 : vector<8x48xf32>
    %110 = vector.extract_strided_slice %12 {offsets = [16, 0], sizes = [8, 48], strides = [1, 1]} : vector<40x48xf32> to vector<8x48xf32>
    %111 = arith.addf %110, %106 : vector<8x48xf32>
    %112 = arith.negf %111 : vector<8x48xf32>
    %113 = math.exp %112 : vector<8x48xf32>
    %cst_55 = arith.constant 1.000000e+00 : f32
    %114 = vector.broadcast %cst_55 : f32 to vector<8x48xf32>
    %115 = arith.addf %114, %113 : vector<8x48xf32>
    %116 = arith.divf %114, %115 : vector<8x48xf32>
    %117 = vector.extract_strided_slice %23 {offsets = [16, 0], sizes = [8, 48], strides = [1, 1]} : vector<40x48xf32> to vector<8x48xf32>
    %118 = arith.addf %117, %107 : vector<8x48xf32>
    %119 = arith.negf %118 : vector<8x48xf32>
    %120 = math.exp %119 : vector<8x48xf32>
    %cst_56 = arith.constant 1.000000e+00 : f32
    %121 = vector.broadcast %cst_56 : f32 to vector<8x48xf32>
    %122 = arith.addf %121, %120 : vector<8x48xf32>
    %123 = arith.divf %121, %122 : vector<8x48xf32>
    %124 = vector.extract_strided_slice %30 {offsets = [16, 0], sizes = [8, 48], strides = [1, 1]} : vector<40x48xf32> to vector<8x48xf32>
    %125 = arith.mulf %116, %109 : vector<8x48xf32>
    %126 = arith.addf %124, %125 : vector<8x48xf32>
    %127 = math.tanh %126 : vector<8x48xf32>
    %cst_57 = arith.constant 1.000000e+00 : f32
    %128 = vector.broadcast %cst_57 : f32 to vector<8x48xf32>
    %129 = arith.subf %128, %123 : vector<8x48xf32>
    %130 = arith.mulf %129, %127 : vector<8x48xf32>
    %131 = arith.mulf %123, %105 : vector<8x48xf32>
    %132 = arith.addf %130, %131 : vector<8x48xf32>
    %c2_i32 = arith.constant 2 : i32
    %133 = vector.broadcast %c2_i32 : i32 to vector<8x1xi32>
    %134 = arith.cmpi sgt, %0, %133 : vector<8x1xi32>
    %135 = vector.shape_cast %134 : vector<8x1xi1> to vector<8x1xi1>
    %136 = vector.broadcast %135 : vector<8x1xi1> to vector<8x48xi1>
    %137 = arith.select %136, %132, %105 : vector<8x48xi1>, vector<8x48xf32>
    %cst_58 = arith.constant dense<0.000000e+00> : vector<8x48xf32>
    %138 = tpu.matmul %137, %32, %cst_58 {dimension_numbers = #tpu.dot_dimension_numbers<[1], [0], [0], [1], [0, 0, 1, 1], [], []>} : vector<8x48xf32>, vector<48x48xf32>, vector<8x48xf32> -> vector<8x48xf32>
    %cst_59 = arith.constant dense<0.000000e+00> : vector<8x48xf32>
    %139 = tpu.matmul %137, %34, %cst_59 {dimension_numbers = #tpu.dot_dimension_numbers<[1], [0], [0], [1], [0, 0, 1, 1], [], []>} : vector<8x48xf32>, vector<48x48xf32>, vector<8x48xf32> -> vector<8x48xf32>
    %cst_60 = arith.constant dense<0.000000e+00> : vector<8x48xf32>
    %140 = tpu.matmul %137, %36, %cst_60 {dimension_numbers = #tpu.dot_dimension_numbers<[1], [0], [0], [1], [0, 0, 1, 1], [], []>} : vector<8x48xf32>, vector<48x48xf32>, vector<8x48xf32> -> vector<8x48xf32>
    %141 = arith.addf %140, %40 : vector<8x48xf32>
    %142 = vector.extract_strided_slice %12 {offsets = [24, 0], sizes = [8, 48], strides = [1, 1]} : vector<40x48xf32> to vector<8x48xf32>
    %143 = arith.addf %142, %138 : vector<8x48xf32>
    %144 = arith.negf %143 : vector<8x48xf32>
    %145 = math.exp %144 : vector<8x48xf32>
    %cst_61 = arith.constant 1.000000e+00 : f32
    %146 = vector.broadcast %cst_61 : f32 to vector<8x48xf32>
    %147 = arith.addf %146, %145 : vector<8x48xf32>
    %148 = arith.divf %146, %147 : vector<8x48xf32>
    %149 = vector.extract_strided_slice %23 {offsets = [24, 0], sizes = [8, 48], strides = [1, 1]} : vector<40x48xf32> to vector<8x48xf32>
    %150 = arith.addf %149, %139 : vector<8x48xf32>
    %151 = arith.negf %150 : vector<8x48xf32>
    %152 = math.exp %151 : vector<8x48xf32>
    %cst_62 = arith.constant 1.000000e+00 : f32
    %153 = vector.broadcast %cst_62 : f32 to vector<8x48xf32>
    %154 = arith.addf %153, %152 : vector<8x48xf32>
    %155 = arith.divf %153, %154 : vector<8x48xf32>
    %156 = vector.extract_strided_slice %30 {offsets = [24, 0], sizes = [8, 48], strides = [1, 1]} : vector<40x48xf32> to vector<8x48xf32>
    %157 = arith.mulf %148, %141 : vector<8x48xf32>
    %158 = arith.addf %156, %157 : vector<8x48xf32>
    %159 = math.tanh %158 : vector<8x48xf32>
    %cst_63 = arith.constant 1.000000e+00 : f32
    %160 = vector.broadcast %cst_63 : f32 to vector<8x48xf32>
    %161 = arith.subf %160, %155 : vector<8x48xf32>
    %162 = arith.mulf %161, %159 : vector<8x48xf32>
    %163 = arith.mulf %155, %137 : vector<8x48xf32>
    %164 = arith.addf %162, %163 : vector<8x48xf32>
    %c3_i32 = arith.constant 3 : i32
    %165 = vector.broadcast %c3_i32 : i32 to vector<8x1xi32>
    %166 = arith.cmpi sgt, %0, %165 : vector<8x1xi32>
    %167 = vector.shape_cast %166 : vector<8x1xi1> to vector<8x1xi1>
    %168 = vector.broadcast %167 : vector<8x1xi1> to vector<8x48xi1>
    %169 = arith.select %168, %164, %137 : vector<8x48xi1>, vector<8x48xf32>
    %cst_64 = arith.constant dense<0.000000e+00> : vector<8x48xf32>
    %170 = tpu.matmul %169, %32, %cst_64 {dimension_numbers = #tpu.dot_dimension_numbers<[1], [0], [0], [1], [0, 0, 1, 1], [], []>} : vector<8x48xf32>, vector<48x48xf32>, vector<8x48xf32> -> vector<8x48xf32>
    %cst_65 = arith.constant dense<0.000000e+00> : vector<8x48xf32>
    %171 = tpu.matmul %169, %34, %cst_65 {dimension_numbers = #tpu.dot_dimension_numbers<[1], [0], [0], [1], [0, 0, 1, 1], [], []>} : vector<8x48xf32>, vector<48x48xf32>, vector<8x48xf32> -> vector<8x48xf32>
    %cst_66 = arith.constant dense<0.000000e+00> : vector<8x48xf32>
    %172 = tpu.matmul %169, %36, %cst_66 {dimension_numbers = #tpu.dot_dimension_numbers<[1], [0], [0], [1], [0, 0, 1, 1], [], []>} : vector<8x48xf32>, vector<48x48xf32>, vector<8x48xf32> -> vector<8x48xf32>
    %173 = arith.addf %172, %40 : vector<8x48xf32>
    %174 = vector.extract_strided_slice %12 {offsets = [32, 0], sizes = [8, 48], strides = [1, 1]} : vector<40x48xf32> to vector<8x48xf32>
    %175 = arith.addf %174, %170 : vector<8x48xf32>
    %176 = arith.negf %175 : vector<8x48xf32>
    %177 = math.exp %176 : vector<8x48xf32>
    %cst_67 = arith.constant 1.000000e+00 : f32
    %178 = vector.broadcast %cst_67 : f32 to vector<8x48xf32>
    %179 = arith.addf %178, %177 : vector<8x48xf32>
    %180 = arith.divf %178, %179 : vector<8x48xf32>
    %181 = vector.extract_strided_slice %23 {offsets = [32, 0], sizes = [8, 48], strides = [1, 1]} : vector<40x48xf32> to vector<8x48xf32>
    %182 = arith.addf %181, %171 : vector<8x48xf32>
    %183 = arith.negf %182 : vector<8x48xf32>
    %184 = math.exp %183 : vector<8x48xf32>
    %cst_68 = arith.constant 1.000000e+00 : f32
    %185 = vector.broadcast %cst_68 : f32 to vector<8x48xf32>
    %186 = arith.addf %185, %184 : vector<8x48xf32>
    %187 = arith.divf %185, %186 : vector<8x48xf32>
    %188 = vector.extract_strided_slice %30 {offsets = [32, 0], sizes = [8, 48], strides = [1, 1]} : vector<40x48xf32> to vector<8x48xf32>
    %189 = arith.mulf %180, %173 : vector<8x48xf32>
    %190 = arith.addf %188, %189 : vector<8x48xf32>
    %191 = math.tanh %190 : vector<8x48xf32>
    %cst_69 = arith.constant 1.000000e+00 : f32
    %192 = vector.broadcast %cst_69 : f32 to vector<8x48xf32>
    %193 = arith.subf %192, %187 : vector<8x48xf32>
    %194 = arith.mulf %193, %191 : vector<8x48xf32>
    %195 = arith.mulf %187, %169 : vector<8x48xf32>
    %196 = arith.addf %194, %195 : vector<8x48xf32>
    %c4_i32 = arith.constant 4 : i32
    %197 = vector.broadcast %c4_i32 : i32 to vector<8x1xi32>
    %198 = arith.cmpi sgt, %0, %197 : vector<8x1xi32>
    %199 = vector.shape_cast %198 : vector<8x1xi1> to vector<8x1xi1>
    %200 = vector.broadcast %199 : vector<8x1xi1> to vector<8x48xi1>
    %201 = arith.select %200, %196, %169 : vector<8x48xi1>, vector<8x48xf32>
    %202 = arith.addf %73, %201 : vector<8x48xf32>
    %c0_70 = arith.constant 0 : index
    %c0_71 = arith.constant 0 : index
    %203 = vector.load %arg1[%c0_70, %c0_71] : memref<40x32xf32, #tpu.memory_space<vmem>>, vector<40x32xf32>
    %c0_72 = arith.constant 0 : index
    %c0_73 = arith.constant 0 : index
    %c0_74 = arith.constant 0 : index
    %204 = vector.load %arg7[%c0_72, %c0_73, %c0_74] : memref<3x32x48xf32, #tpu.memory_space<vmem>>, vector<1x32x48xf32>
    %205 = vector.shape_cast %204 : vector<1x32x48xf32> to vector<32x48xf32>
    %cst_75 = arith.constant dense<0.000000e+00> : vector<40x48xf32>
    %206 = tpu.matmul %203, %205, %cst_75 {dimension_numbers = #tpu.dot_dimension_numbers<[1], [0], [0], [1], [0, 0, 1, 1], [], []>} : vector<40x32xf32>, vector<32x48xf32>, vector<40x48xf32> -> vector<40x48xf32>
    %c0_76 = arith.constant 0 : index
    %c0_77 = arith.constant 0 : index
    %c0_78 = arith.constant 0 : index
    %207 = vector.load %arg8[%c0_76, %c0_77, %c0_78] : memref<3x1x48xf32, #tpu.memory_space<vmem>>, vector<1x1x48xf32>
    %208 = vector.shape_cast %207 : vector<1x1x48xf32> to vector<1x48xf32>
    %209 = vector.broadcast %208 : vector<1x48xf32> to vector<40x48xf32>
    %210 = arith.addf %206, %209 : vector<40x48xf32>
    %c0_79 = arith.constant 0 : index
    %c0_80 = arith.constant 0 : index
    %c0_81 = arith.constant 0 : index
    %211 = vector.load %arg10[%c0_79, %c0_80, %c0_81] : memref<3x1x48xf32, #tpu.memory_space<vmem>>, vector<1x1x48xf32>
    %212 = vector.shape_cast %211 : vector<1x1x48xf32> to vector<1x48xf32>
    %213 = vector.broadcast %212 : vector<1x48xf32> to vector<40x48xf32>
    %214 = arith.addf %210, %213 : vector<40x48xf32>
    %c1_82 = arith.constant 1 : index
    %c0_83 = arith.constant 0 : index
    %c0_84 = arith.constant 0 : index
    %215 = vector.load %arg7[%c1_82, %c0_83, %c0_84] : memref<3x32x48xf32, #tpu.memory_space<vmem>>, vector<1x32x48xf32>
    %216 = vector.shape_cast %215 : vector<1x32x48xf32> to vector<32x48xf32>
    %cst_85 = arith.constant dense<0.000000e+00> : vector<40x48xf32>
    %217 = tpu.matmul %203, %216, %cst_85 {dimension_numbers = #tpu.dot_dimension_numbers<[1], [0], [0], [1], [0, 0, 1, 1], [], []>} : vector<40x32xf32>, vector<32x48xf32>, vector<40x48xf32> -> vector<40x48xf32>
    %c1_86 = arith.constant 1 : index
    %c0_87 = arith.constant 0 : index
    %c0_88 = arith.constant 0 : index
    %218 = vector.load %arg8[%c1_86, %c0_87, %c0_88] : memref<3x1x48xf32, #tpu.memory_space<vmem>>, vector<1x1x48xf32>
    %219 = vector.shape_cast %218 : vector<1x1x48xf32> to vector<1x48xf32>
    %220 = vector.broadcast %219 : vector<1x48xf32> to vector<40x48xf32>
    %221 = arith.addf %217, %220 : vector<40x48xf32>
    %c1_89 = arith.constant 1 : index
    %c0_90 = arith.constant 0 : index
    %c0_91 = arith.constant 0 : index
    %222 = vector.load %arg10[%c1_89, %c0_90, %c0_91] : memref<3x1x48xf32, #tpu.memory_space<vmem>>, vector<1x1x48xf32>
    %223 = vector.shape_cast %222 : vector<1x1x48xf32> to vector<1x48xf32>
    %224 = vector.broadcast %223 : vector<1x48xf32> to vector<40x48xf32>
    %225 = arith.addf %221, %224 : vector<40x48xf32>
    %c2_92 = arith.constant 2 : index
    %c0_93 = arith.constant 0 : index
    %c0_94 = arith.constant 0 : index
    %226 = vector.load %arg7[%c2_92, %c0_93, %c0_94] : memref<3x32x48xf32, #tpu.memory_space<vmem>>, vector<1x32x48xf32>
    %227 = vector.shape_cast %226 : vector<1x32x48xf32> to vector<32x48xf32>
    %cst_95 = arith.constant dense<0.000000e+00> : vector<40x48xf32>
    %228 = tpu.matmul %203, %227, %cst_95 {dimension_numbers = #tpu.dot_dimension_numbers<[1], [0], [0], [1], [0, 0, 1, 1], [], []>} : vector<40x32xf32>, vector<32x48xf32>, vector<40x48xf32> -> vector<40x48xf32>
    %c2_96 = arith.constant 2 : index
    %c0_97 = arith.constant 0 : index
    %c0_98 = arith.constant 0 : index
    %229 = vector.load %arg8[%c2_96, %c0_97, %c0_98] : memref<3x1x48xf32, #tpu.memory_space<vmem>>, vector<1x1x48xf32>
    %230 = vector.shape_cast %229 : vector<1x1x48xf32> to vector<1x48xf32>
    %231 = vector.broadcast %230 : vector<1x48xf32> to vector<40x48xf32>
    %232 = arith.addf %228, %231 : vector<40x48xf32>
    %c0_99 = arith.constant 0 : index
    %c0_100 = arith.constant 0 : index
    %c0_101 = arith.constant 0 : index
    %233 = vector.load %arg9[%c0_99, %c0_100, %c0_101] : memref<3x48x48xf32, #tpu.memory_space<vmem>>, vector<1x48x48xf32>
    %234 = vector.shape_cast %233 : vector<1x48x48xf32> to vector<48x48xf32>
    %c1_102 = arith.constant 1 : index
    %c0_103 = arith.constant 0 : index
    %c0_104 = arith.constant 0 : index
    %235 = vector.load %arg9[%c1_102, %c0_103, %c0_104] : memref<3x48x48xf32, #tpu.memory_space<vmem>>, vector<1x48x48xf32>
    %236 = vector.shape_cast %235 : vector<1x48x48xf32> to vector<48x48xf32>
    %c2_105 = arith.constant 2 : index
    %c0_106 = arith.constant 0 : index
    %c0_107 = arith.constant 0 : index
    %237 = vector.load %arg9[%c2_105, %c0_106, %c0_107] : memref<3x48x48xf32, #tpu.memory_space<vmem>>, vector<1x48x48xf32>
    %238 = vector.shape_cast %237 : vector<1x48x48xf32> to vector<48x48xf32>
    %c2_108 = arith.constant 2 : index
    %c0_109 = arith.constant 0 : index
    %c0_110 = arith.constant 0 : index
    %239 = vector.load %arg10[%c2_108, %c0_109, %c0_110] : memref<3x1x48xf32, #tpu.memory_space<vmem>>, vector<1x1x48xf32>
    %240 = vector.shape_cast %239 : vector<1x1x48xf32> to vector<1x48xf32>
    %241 = vector.shape_cast %240 : vector<1x48xf32> to vector<1x48xf32>
    %242 = vector.broadcast %241 : vector<1x48xf32> to vector<8x48xf32>
    %cst_111 = arith.constant 0.000000e+00 : f32
    %243 = vector.broadcast %cst_111 : f32 to vector<8x48xf32>
    %cst_112 = arith.constant dense<0.000000e+00> : vector<8x48xf32>
    %244 = tpu.matmul %243, %234, %cst_112 {dimension_numbers = #tpu.dot_dimension_numbers<[1], [0], [0], [1], [0, 0, 1, 1], [], []>} : vector<8x48xf32>, vector<48x48xf32>, vector<8x48xf32> -> vector<8x48xf32>
    %cst_113 = arith.constant dense<0.000000e+00> : vector<8x48xf32>
    %245 = tpu.matmul %243, %236, %cst_113 {dimension_numbers = #tpu.dot_dimension_numbers<[1], [0], [0], [1], [0, 0, 1, 1], [], []>} : vector<8x48xf32>, vector<48x48xf32>, vector<8x48xf32> -> vector<8x48xf32>
    %cst_114 = arith.constant dense<0.000000e+00> : vector<8x48xf32>
    %246 = tpu.matmul %243, %238, %cst_114 {dimension_numbers = #tpu.dot_dimension_numbers<[1], [0], [0], [1], [0, 0, 1, 1], [], []>} : vector<8x48xf32>, vector<48x48xf32>, vector<8x48xf32> -> vector<8x48xf32>
    %247 = arith.addf %246, %242 : vector<8x48xf32>
    %248 = vector.extract_strided_slice %214 {offsets = [0, 0], sizes = [8, 48], strides = [1, 1]} : vector<40x48xf32> to vector<8x48xf32>
    %249 = arith.addf %248, %244 : vector<8x48xf32>
    %250 = arith.negf %249 : vector<8x48xf32>
    %251 = math.exp %250 : vector<8x48xf32>
    %cst_115 = arith.constant 1.000000e+00 : f32
    %252 = vector.broadcast %cst_115 : f32 to vector<8x48xf32>
    %253 = arith.addf %252, %251 : vector<8x48xf32>
    %254 = arith.divf %252, %253 : vector<8x48xf32>
    %255 = vector.extract_strided_slice %225 {offsets = [0, 0], sizes = [8, 48], strides = [1, 1]} : vector<40x48xf32> to vector<8x48xf32>
    %256 = arith.addf %255, %245 : vector<8x48xf32>
    %257 = arith.negf %256 : vector<8x48xf32>
    %258 = math.exp %257 : vector<8x48xf32>
    %cst_116 = arith.constant 1.000000e+00 : f32
    %259 = vector.broadcast %cst_116 : f32 to vector<8x48xf32>
    %260 = arith.addf %259, %258 : vector<8x48xf32>
    %261 = arith.divf %259, %260 : vector<8x48xf32>
    %262 = vector.extract_strided_slice %232 {offsets = [0, 0], sizes = [8, 48], strides = [1, 1]} : vector<40x48xf32> to vector<8x48xf32>
    %263 = arith.mulf %254, %247 : vector<8x48xf32>
    %264 = arith.addf %262, %263 : vector<8x48xf32>
    %265 = math.tanh %264 : vector<8x48xf32>
    %cst_117 = arith.constant 1.000000e+00 : f32
    %266 = vector.broadcast %cst_117 : f32 to vector<8x48xf32>
    %267 = arith.subf %266, %261 : vector<8x48xf32>
    %268 = arith.mulf %267, %265 : vector<8x48xf32>
    %269 = arith.mulf %261, %243 : vector<8x48xf32>
    %270 = arith.addf %268, %269 : vector<8x48xf32>
    %c0_i32_118 = arith.constant 0 : i32
    %271 = vector.broadcast %c0_i32_118 : i32 to vector<8x1xi32>
    %272 = arith.cmpi sgt, %0, %271 : vector<8x1xi32>
    %273 = vector.shape_cast %272 : vector<8x1xi1> to vector<8x1xi1>
    %274 = vector.broadcast %273 : vector<8x1xi1> to vector<8x48xi1>
    %275 = arith.select %274, %270, %243 : vector<8x48xi1>, vector<8x48xf32>
    %cst_119 = arith.constant dense<0.000000e+00> : vector<8x48xf32>
    %276 = tpu.matmul %275, %234, %cst_119 {dimension_numbers = #tpu.dot_dimension_numbers<[1], [0], [0], [1], [0, 0, 1, 1], [], []>} : vector<8x48xf32>, vector<48x48xf32>, vector<8x48xf32> -> vector<8x48xf32>
    %cst_120 = arith.constant dense<0.000000e+00> : vector<8x48xf32>
    %277 = tpu.matmul %275, %236, %cst_120 {dimension_numbers = #tpu.dot_dimension_numbers<[1], [0], [0], [1], [0, 0, 1, 1], [], []>} : vector<8x48xf32>, vector<48x48xf32>, vector<8x48xf32> -> vector<8x48xf32>
    %cst_121 = arith.constant dense<0.000000e+00> : vector<8x48xf32>
    %278 = tpu.matmul %275, %238, %cst_121 {dimension_numbers = #tpu.dot_dimension_numbers<[1], [0], [0], [1], [0, 0, 1, 1], [], []>} : vector<8x48xf32>, vector<48x48xf32>, vector<8x48xf32> -> vector<8x48xf32>
    %279 = arith.addf %278, %242 : vector<8x48xf32>
    %280 = vector.extract_strided_slice %214 {offsets = [8, 0], sizes = [8, 48], strides = [1, 1]} : vector<40x48xf32> to vector<8x48xf32>
    %281 = arith.addf %280, %276 : vector<8x48xf32>
    %282 = arith.negf %281 : vector<8x48xf32>
    %283 = math.exp %282 : vector<8x48xf32>
    %cst_122 = arith.constant 1.000000e+00 : f32
    %284 = vector.broadcast %cst_122 : f32 to vector<8x48xf32>
    %285 = arith.addf %284, %283 : vector<8x48xf32>
    %286 = arith.divf %284, %285 : vector<8x48xf32>
    %287 = vector.extract_strided_slice %225 {offsets = [8, 0], sizes = [8, 48], strides = [1, 1]} : vector<40x48xf32> to vector<8x48xf32>
    %288 = arith.addf %287, %277 : vector<8x48xf32>
    %289 = arith.negf %288 : vector<8x48xf32>
    %290 = math.exp %289 : vector<8x48xf32>
    %cst_123 = arith.constant 1.000000e+00 : f32
    %291 = vector.broadcast %cst_123 : f32 to vector<8x48xf32>
    %292 = arith.addf %291, %290 : vector<8x48xf32>
    %293 = arith.divf %291, %292 : vector<8x48xf32>
    %294 = vector.extract_strided_slice %232 {offsets = [8, 0], sizes = [8, 48], strides = [1, 1]} : vector<40x48xf32> to vector<8x48xf32>
    %295 = arith.mulf %286, %279 : vector<8x48xf32>
    %296 = arith.addf %294, %295 : vector<8x48xf32>
    %297 = math.tanh %296 : vector<8x48xf32>
    %cst_124 = arith.constant 1.000000e+00 : f32
    %298 = vector.broadcast %cst_124 : f32 to vector<8x48xf32>
    %299 = arith.subf %298, %293 : vector<8x48xf32>
    %300 = arith.mulf %299, %297 : vector<8x48xf32>
    %301 = arith.mulf %293, %275 : vector<8x48xf32>
    %302 = arith.addf %300, %301 : vector<8x48xf32>
    %c1_i32_125 = arith.constant 1 : i32
    %303 = vector.broadcast %c1_i32_125 : i32 to vector<8x1xi32>
    %304 = arith.cmpi sgt, %0, %303 : vector<8x1xi32>
    %305 = vector.shape_cast %304 : vector<8x1xi1> to vector<8x1xi1>
    %306 = vector.broadcast %305 : vector<8x1xi1> to vector<8x48xi1>
    %307 = arith.select %306, %302, %275 : vector<8x48xi1>, vector<8x48xf32>
    %cst_126 = arith.constant dense<0.000000e+00> : vector<8x48xf32>
    %308 = tpu.matmul %307, %234, %cst_126 {dimension_numbers = #tpu.dot_dimension_numbers<[1], [0], [0], [1], [0, 0, 1, 1], [], []>} : vector<8x48xf32>, vector<48x48xf32>, vector<8x48xf32> -> vector<8x48xf32>
    %cst_127 = arith.constant dense<0.000000e+00> : vector<8x48xf32>
    %309 = tpu.matmul %307, %236, %cst_127 {dimension_numbers = #tpu.dot_dimension_numbers<[1], [0], [0], [1], [0, 0, 1, 1], [], []>} : vector<8x48xf32>, vector<48x48xf32>, vector<8x48xf32> -> vector<8x48xf32>
    %cst_128 = arith.constant dense<0.000000e+00> : vector<8x48xf32>
    %310 = tpu.matmul %307, %238, %cst_128 {dimension_numbers = #tpu.dot_dimension_numbers<[1], [0], [0], [1], [0, 0, 1, 1], [], []>} : vector<8x48xf32>, vector<48x48xf32>, vector<8x48xf32> -> vector<8x48xf32>
    %311 = arith.addf %310, %242 : vector<8x48xf32>
    %312 = vector.extract_strided_slice %214 {offsets = [16, 0], sizes = [8, 48], strides = [1, 1]} : vector<40x48xf32> to vector<8x48xf32>
    %313 = arith.addf %312, %308 : vector<8x48xf32>
    %314 = arith.negf %313 : vector<8x48xf32>
    %315 = math.exp %314 : vector<8x48xf32>
    %cst_129 = arith.constant 1.000000e+00 : f32
    %316 = vector.broadcast %cst_129 : f32 to vector<8x48xf32>
    %317 = arith.addf %316, %315 : vector<8x48xf32>
    %318 = arith.divf %316, %317 : vector<8x48xf32>
    %319 = vector.extract_strided_slice %225 {offsets = [16, 0], sizes = [8, 48], strides = [1, 1]} : vector<40x48xf32> to vector<8x48xf32>
    %320 = arith.addf %319, %309 : vector<8x48xf32>
    %321 = arith.negf %320 : vector<8x48xf32>
    %322 = math.exp %321 : vector<8x48xf32>
    %cst_130 = arith.constant 1.000000e+00 : f32
    %323 = vector.broadcast %cst_130 : f32 to vector<8x48xf32>
    %324 = arith.addf %323, %322 : vector<8x48xf32>
    %325 = arith.divf %323, %324 : vector<8x48xf32>
    %326 = vector.extract_strided_slice %232 {offsets = [16, 0], sizes = [8, 48], strides = [1, 1]} : vector<40x48xf32> to vector<8x48xf32>
    %327 = arith.mulf %318, %311 : vector<8x48xf32>
    %328 = arith.addf %326, %327 : vector<8x48xf32>
    %329 = math.tanh %328 : vector<8x48xf32>
    %cst_131 = arith.constant 1.000000e+00 : f32
    %330 = vector.broadcast %cst_131 : f32 to vector<8x48xf32>
    %331 = arith.subf %330, %325 : vector<8x48xf32>
    %332 = arith.mulf %331, %329 : vector<8x48xf32>
    %333 = arith.mulf %325, %307 : vector<8x48xf32>
    %334 = arith.addf %332, %333 : vector<8x48xf32>
    %c2_i32_132 = arith.constant 2 : i32
    %335 = vector.broadcast %c2_i32_132 : i32 to vector<8x1xi32>
    %336 = arith.cmpi sgt, %0, %335 : vector<8x1xi32>
    %337 = vector.shape_cast %336 : vector<8x1xi1> to vector<8x1xi1>
    %338 = vector.broadcast %337 : vector<8x1xi1> to vector<8x48xi1>
    %339 = arith.select %338, %334, %307 : vector<8x48xi1>, vector<8x48xf32>
    %cst_133 = arith.constant dense<0.000000e+00> : vector<8x48xf32>
    %340 = tpu.matmul %339, %234, %cst_133 {dimension_numbers = #tpu.dot_dimension_numbers<[1], [0], [0], [1], [0, 0, 1, 1], [], []>} : vector<8x48xf32>, vector<48x48xf32>, vector<8x48xf32> -> vector<8x48xf32>
    %cst_134 = arith.constant dense<0.000000e+00> : vector<8x48xf32>
    %341 = tpu.matmul %339, %236, %cst_134 {dimension_numbers = #tpu.dot_dimension_numbers<[1], [0], [0], [1], [0, 0, 1, 1], [], []>} : vector<8x48xf32>, vector<48x48xf32>, vector<8x48xf32> -> vector<8x48xf32>
    %cst_135 = arith.constant dense<0.000000e+00> : vector<8x48xf32>
    %342 = tpu.matmul %339, %238, %cst_135 {dimension_numbers = #tpu.dot_dimension_numbers<[1], [0], [0], [1], [0, 0, 1, 1], [], []>} : vector<8x48xf32>, vector<48x48xf32>, vector<8x48xf32> -> vector<8x48xf32>
    %343 = arith.addf %342, %242 : vector<8x48xf32>
    %344 = vector.extract_strided_slice %214 {offsets = [24, 0], sizes = [8, 48], strides = [1, 1]} : vector<40x48xf32> to vector<8x48xf32>
    %345 = arith.addf %344, %340 : vector<8x48xf32>
    %346 = arith.negf %345 : vector<8x48xf32>
    %347 = math.exp %346 : vector<8x48xf32>
    %cst_136 = arith.constant 1.000000e+00 : f32
    %348 = vector.broadcast %cst_136 : f32 to vector<8x48xf32>
    %349 = arith.addf %348, %347 : vector<8x48xf32>
    %350 = arith.divf %348, %349 : vector<8x48xf32>
    %351 = vector.extract_strided_slice %225 {offsets = [24, 0], sizes = [8, 48], strides = [1, 1]} : vector<40x48xf32> to vector<8x48xf32>
    %352 = arith.addf %351, %341 : vector<8x48xf32>
    %353 = arith.negf %352 : vector<8x48xf32>
    %354 = math.exp %353 : vector<8x48xf32>
    %cst_137 = arith.constant 1.000000e+00 : f32
    %355 = vector.broadcast %cst_137 : f32 to vector<8x48xf32>
    %356 = arith.addf %355, %354 : vector<8x48xf32>
    %357 = arith.divf %355, %356 : vector<8x48xf32>
    %358 = vector.extract_strided_slice %232 {offsets = [24, 0], sizes = [8, 48], strides = [1, 1]} : vector<40x48xf32> to vector<8x48xf32>
    %359 = arith.mulf %350, %343 : vector<8x48xf32>
    %360 = arith.addf %358, %359 : vector<8x48xf32>
    %361 = math.tanh %360 : vector<8x48xf32>
    %cst_138 = arith.constant 1.000000e+00 : f32
    %362 = vector.broadcast %cst_138 : f32 to vector<8x48xf32>
    %363 = arith.subf %362, %357 : vector<8x48xf32>
    %364 = arith.mulf %363, %361 : vector<8x48xf32>
    %365 = arith.mulf %357, %339 : vector<8x48xf32>
    %366 = arith.addf %364, %365 : vector<8x48xf32>
    %c3_i32_139 = arith.constant 3 : i32
    %367 = vector.broadcast %c3_i32_139 : i32 to vector<8x1xi32>
    %368 = arith.cmpi sgt, %0, %367 : vector<8x1xi32>
    %369 = vector.shape_cast %368 : vector<8x1xi1> to vector<8x1xi1>
    %370 = vector.broadcast %369 : vector<8x1xi1> to vector<8x48xi1>
    %371 = arith.select %370, %366, %339 : vector<8x48xi1>, vector<8x48xf32>
    %cst_140 = arith.constant dense<0.000000e+00> : vector<8x48xf32>
    %372 = tpu.matmul %371, %234, %cst_140 {dimension_numbers = #tpu.dot_dimension_numbers<[1], [0], [0], [1], [0, 0, 1, 1], [], []>} : vector<8x48xf32>, vector<48x48xf32>, vector<8x48xf32> -> vector<8x48xf32>
    %cst_141 = arith.constant dense<0.000000e+00> : vector<8x48xf32>
    %373 = tpu.matmul %371, %236, %cst_141 {dimension_numbers = #tpu.dot_dimension_numbers<[1], [0], [0], [1], [0, 0, 1, 1], [], []>} : vector<8x48xf32>, vector<48x48xf32>, vector<8x48xf32> -> vector<8x48xf32>
    %cst_142 = arith.constant dense<0.000000e+00> : vector<8x48xf32>
    %374 = tpu.matmul %371, %238, %cst_142 {dimension_numbers = #tpu.dot_dimension_numbers<[1], [0], [0], [1], [0, 0, 1, 1], [], []>} : vector<8x48xf32>, vector<48x48xf32>, vector<8x48xf32> -> vector<8x48xf32>
    %375 = arith.addf %374, %242 : vector<8x48xf32>
    %376 = vector.extract_strided_slice %214 {offsets = [32, 0], sizes = [8, 48], strides = [1, 1]} : vector<40x48xf32> to vector<8x48xf32>
    %377 = arith.addf %376, %372 : vector<8x48xf32>
    %378 = arith.negf %377 : vector<8x48xf32>
    %379 = math.exp %378 : vector<8x48xf32>
    %cst_143 = arith.constant 1.000000e+00 : f32
    %380 = vector.broadcast %cst_143 : f32 to vector<8x48xf32>
    %381 = arith.addf %380, %379 : vector<8x48xf32>
    %382 = arith.divf %380, %381 : vector<8x48xf32>
    %383 = vector.extract_strided_slice %225 {offsets = [32, 0], sizes = [8, 48], strides = [1, 1]} : vector<40x48xf32> to vector<8x48xf32>
    %384 = arith.addf %383, %373 : vector<8x48xf32>
    %385 = arith.negf %384 : vector<8x48xf32>
    %386 = math.exp %385 : vector<8x48xf32>
    %cst_144 = arith.constant 1.000000e+00 : f32
    %387 = vector.broadcast %cst_144 : f32 to vector<8x48xf32>
    %388 = arith.addf %387, %386 : vector<8x48xf32>
    %389 = arith.divf %387, %388 : vector<8x48xf32>
    %390 = vector.extract_strided_slice %232 {offsets = [32, 0], sizes = [8, 48], strides = [1, 1]} : vector<40x48xf32> to vector<8x48xf32>
    %391 = arith.mulf %382, %375 : vector<8x48xf32>
    %392 = arith.addf %390, %391 : vector<8x48xf32>
    %393 = math.tanh %392 : vector<8x48xf32>
    %cst_145 = arith.constant 1.000000e+00 : f32
    %394 = vector.broadcast %cst_145 : f32 to vector<8x48xf32>
    %395 = arith.subf %394, %389 : vector<8x48xf32>
    %396 = arith.mulf %395, %393 : vector<8x48xf32>
    %397 = arith.mulf %389, %371 : vector<8x48xf32>
    %398 = arith.addf %396, %397 : vector<8x48xf32>
    %c4_i32_146 = arith.constant 4 : i32
    %399 = vector.broadcast %c4_i32_146 : i32 to vector<8x1xi32>
    %400 = arith.cmpi sgt, %0, %399 : vector<8x1xi32>
    %401 = vector.shape_cast %400 : vector<8x1xi1> to vector<8x1xi1>
    %402 = vector.broadcast %401 : vector<8x1xi1> to vector<8x48xi1>
    %403 = arith.select %402, %398, %371 : vector<8x48xi1>, vector<8x48xf32>
    %404 = arith.addf %275, %403 : vector<8x48xf32>
    %405 = arith.addf %202, %404 : vector<8x48xf32>
    %c0_147 = arith.constant 0 : index
    %c0_148 = arith.constant 0 : index
    %406 = vector.load %arg11[%c0_147, %c0_148] : memref<8x48xf32, #tpu.memory_space<vmem>>, vector<8x48xf32>
    tpu.vector_store %arg11[%c0_147, %c0_148], %405 {strides = array<i32>} : memref<8x48xf32, #tpu.memory_space<vmem>>, vector<8x48xf32>,
    return
  }
}

</mosaic_0001>

<bundles_post_ra>
// kernel: tpu_custom_call.1
= control target key start
LH: loop header
LB: loop body
LE: loop exit
PB: predicated region body
PF: predicated region fallthrough
CT: control target
= control target key end

     0   :  { %16 = vsyncpa [#allocation3], 0  ;;  %s5458_s0 = inlined_call_operand.vmem [shape: f32[40,32], index: 0, kind: input, shape index: {}]   ;;  %s5459_s1 = inlined_call_operand.vmem [shape: f32[40,32], index: 1, kind: input, shape index: {}]   ;;  %s5460_s2 = inlined_call_operand.vmem [shape: s32[8,1], index: 2, kind: input, shape index: {}]   ;;  %s5461_s3 = inlined_call_operand.hbm [shape: f32[3,32,48], index: 3, kind: input, shape index: {}]   ;;  %s5462_s4 = inlined_call_operand.vmem [shape: f32[3,1,48], index: 4, kind: input, shape index: {}]   ;;  %s5463_s5 = inlined_call_operand.vmem [shape: f32[3,48,48], index: 5, kind: input, shape index: {}]   ;;  %s5464_s6 = inlined_call_operand.vmem [shape: f32[3,1,48], index: 6, kind: input, shape index: {}]   ;;  %s5465_s7 = inlined_call_operand.hbm [shape: f32[3,32,48], index: 7, kind: input, shape index: {}]   ;;  %s5466_s8 = inlined_call_operand.vmem [shape: f32[3,1,48], index: 8, kind: input, shape index: {}]   ;;  %s5467_s9 = inlined_call_operand.hbm [shape: f32[3,48,48], index: 9, kind: input, shape index: {}]   ;;  %s5468_s10 = inlined_call_operand.vmem [shape: f32[3,1,48], index: 10, kind: input, shape index: {}]   ;;  %s5469_s11 = inlined_call_operand.hbm [shape: f32[8,48], index: 11, kind: output, shape index: {}]  }
   0x1   :  { %17 = vsyncpa [#allocation6], 0 }
   0x2   :  { %18 = vsyncpa [#allocation4], 0  ;;  %s4395_s17 = smov [#allocation5]   ;;  %s4396_s19 = smov [#allocation2]  }
   0x3   :  { %s48_s18 = sshll.u32 %s4395_s17, 4  ;;  %s30_s20 = sshll.u32 %s4396_s19, 4  ;;  %s49_s18 = int_to_ptr.vmem [resolvable:$true] %s48_s18  ;;  %s31_s20 = int_to_ptr.vmem [resolvable:$true] %s30_s20 }
   0x4   :  { %s4317_s21 = scalar_lea.vmem %s49_s18, 1536  ;;  %p4322_p1 = scmp.lt.s32.totalorder %s49_s18, %s49_s18 }
   0x5   :  { %p4318_p0 = scmp.ne.s32.totalorder %s49_s18, %s4317_s21  ;;  %p4323_p2 = scmp.lt.s32.totalorder %s4317_s21, %s4317_s21 }
   0x7   :  { %p4324_p3 = por %p4323_p2, %p4322_p1 }
   0x9   :  { %p4325_p4 = pnand %p4324_p3, %p4318_p0 }
   0xb   :  { %4328 = shalt.err (!%p4325_p4)
}
   0xc   :  { %s4397_s22 = smov 128   ;;  %s4398_s23 = smov 8  }
   0xd   :  { %54 = dma.hbm_to_vmem [thread:$0]  %s5465_s7, 1536, %s49_s18, [#allocation6], %s4397_s22, %s4397_s22, %s4398_s23  }
   0xe   :  { %s4337_s26 = scalar_lea.vmem %s31_s20, 1536  ;;  %p4342_p6 = scmp.lt.s32.totalorder %s31_s20, %s31_s20 }
   0xf   :  { %p4338_p5 = scmp.ne.s32.totalorder %s31_s20, %s4337_s26  ;;  %p4343_p7 = scmp.lt.s32.totalorder %s4337_s26, %s4337_s26 }
  0x11   :  { %p4344_p8 = por %p4343_p7, %p4342_p6 }
  0x13   :  { %p4345_p9 = pnand %p4344_p8, %p4338_p5 }
  0x15   :  { %4348 = shalt.err (!%p4345_p9)
}
  0x16   :  { %36 = dma.hbm_to_vmem [thread:$0]  %s5461_s3, 1536, %s31_s20, [#allocation3], %s4397_s22, %s4397_s22, %s4398_s23  }
  0x17   :  { %s4399_s29 = smov [#allocation7]  }
  0x18   :  { %s62_s30 = sshll.u32 %s4399_s29, 4  ;;  %s63_s30 = int_to_ptr.vmem [resolvable:$true] %s62_s30 }
  0x19   :  { %s4357_s12 = scalar_lea.vmem %s63_s30, 2304  ;;  %p4362_p11 = scmp.lt.s32.totalorder %s63_s30, %s63_s30 }
  0x1a   :  { %p4358_p10 = scmp.ne.s32.totalorder %s63_s30, %s4357_s12  ;;  %p4363_p12 = scmp.lt.s32.totalorder %s4357_s12, %s4357_s12 }
  0x1c   :  { %p4364_p13 = por %p4363_p12, %p4362_p11 }
  0x1e   :  { %p4365_p0 = pnand %p4364_p13, %p4358_p10 }
  0x20   :  { %4368 = shalt.err (!%p4365_p0)
}
  0x21   :  { %68 = dma.hbm_to_vmem [thread:$0]  %s5467_s9, 2304, %s63_s30, [#allocation6], %s4397_s22, %s4397_s22, %s4398_s23  }
  0x22   :  { %4389 = dma.done.wait [#allocation3], 1536  }
  0x23   :  { %4390 = vsyncadd [#allocation3], 4294965760 }
  0x24   :  { %4391 = dma.done.wait [#allocation6], 3840  }
  0x25   :  { %4392 = vsyncadd [#allocation6], 4294963456  ;;  %v4400_v0 = vmov 0.0   ;;  %vm4401_vm0 = vmmov 0   ;;  %v4402_v1 = vmov 0   ;;  %v219_v2 = vld [vmem:[#allocation2 + $0x38] sm:$0xff] }
  0x26   :  { %3633 = vmatprep.subr.mxu1 %v4400_v0  ;;  %3641 = vmatprep.mubr.msk.f32.mxu1 %vm4401_vm0, %v4400_v0  ;;  %v218_v3 = vld [vmem:[#allocation2 + $0x30] sm:$0xff]  ;;  %v217_v4 = vld [vmem:[#allocation2 + $0x28] sm:$0xff]  ;;  %v89_v5 = vld [vmem:[#allocation2 + $0x18] sm:$0xff]  ;;  %vm97_vm1 = vcmask 261120   ;;  %vm462_vm6 = vcmask 392192  }
  0x27   :  { %3610 = vmatprep.subr.mxu0 %v4400_v0  ;;  %3618 = vmatprep.mubr.msk.f32.mxu0 %vm4401_vm0, %v4400_v0  ;;  %v88_v6 = vld [vmem:[#allocation2 + $0x10] sm:$0xff]  ;;  %v216_v7 = vld [vmem:[#allocation2 + $0x20] sm:$0xff]  ;;  %v87_v8 = vld [vmem:[#allocation2 + $0x8] sm:$0xff] }
  0x28   :  { %4207 = vset.pattern.permute.xlu0 %v4402_v1  ;;  %4208 = vset.pattern.permute.xlu1 %v4402_v1  ;;  %v4487_v9 = vld [vmem:[%s5458_s0] sm:$0xff]  ;;  %v4493_v10 = vld [vmem:[%s5463_s5 + $0x28] sm:$0xff]  ;;  %v4517_v14 = vld [vmem:[%s5463_s5 + $0x18] sm:$0xff] }
  0x29   :  { %3634 = vmatpush3.msra.mxu1 %v219_v2  ;;  %3611 = vmatpush3.msra.mxu0 %v89_v5  ;;  %v4502_v11 = vld [vmem:[%s5463_s5 + $0x20] sm:$0xff]  ;;  %v4510_v13 = vld [vmem:[%s5458_s0 + $0x8] sm:$0xff]  ;;  %v4526_v15 = vld [vmem:[%s5463_s5 + $0x10] sm:$0xff] }
  0x2a   :  { %3635 = vmatprep.subr.mxu1 %v4400_v0  ;;  %3612 = vmatprep.subr.mxu0 %v4400_v0  ;;  %v86_v12 = vld [vmem:[#allocation2] sm:$0xff]  ;;  %v4533_v16 = vld [vmem:[%s5458_s0 + $0x10] sm:$0xff]  ;;  %v335_v17 = vld [vmem:[#allocation2 + $0x58] sm:$0xff] }
  0x2b   :  { %3636 = vmatpush3.msra.mxu1 %v218_v3  ;;  %3613 = vmatpush3.msra.mxu0 %v88_v6  ;;  %v4548_v18 = vld [vmem:[%s5463_s5 + $0x8] sm:$0xff]  ;;  %v4555_v19 = vld [vmem:[%s5458_s0 + $0x18] sm:$0xff]  ;;  %v4560_v20 = vld [vmem:[%s5460_s2] sm:$0xff] }
  0x2c   :  { %3637 = vmatprep.subr.mxu1 %v4400_v0  ;;  %3614 = vmatprep.subr.mxu0 %v4400_v0  ;;  %v4571_v21 = vld [vmem:[%s5463_s5] sm:$0xff]  ;;  %v334_v22 = vld [vmem:[#allocation2 + $0x50] sm:$0xff]  ;;  %vm697_vm2 = vcmp.gt.s32.totalorder %v4560_v20, 0  ;;  %v333_v25 = vld [vmem:[#allocation2 + $0x48] sm:$0xff]  ;;  %vm938_vm3 = vcmp.gt.s32.totalorder %v4560_v20, 1  ;;  %vm1661_vm4 = vcmp.gt.s32.totalorder %v4560_v20, 4 }
  0x2d   :  { %3638 = vmatpush3.msra.mxu1 %v217_v4  ;;  %3615 = vmatpush3.msra.mxu0 %v87_v8  ;;  %v4582_v23 = vld [vmem:[%s5458_s0 + $0x20] sm:$0xff]  ;;  %v698_v24 = vsel %vm697_vm2, 1, %v4402_v1  ;;  %v4600_v26 = vld [vmem:[%s5463_s5 + $0x58] sm:$0xff]  ;;  %v4610_v28 = vld [vmem:[%s5463_s5 + $0x50] sm:$0xff]  ;;  %v939_v35 = vsel %vm938_vm3, 1, %v4402_v1  ;;  %v1662_v38 = vsel %vm1661_vm4, 1, %v4402_v1 }
  0x2e   :  { %3639 = vmatprep.subr.mxu1 %v4400_v0  ;;  %3616 = vmatprep.subr.mxu0 %v4400_v0  ;;  %v332_v27 = vld [vmem:[#allocation2 + $0x40] sm:$0xff]  ;;  %v4618_v29 = vld [vmem:[%s5463_s5 + $0x48] sm:$0xff]  ;;  %v4644_v32 = vld [vmem:[%s5463_s5 + $0x38] sm:$0xff]  ;;  %vm1179_vm7 = vcmp.gt.s32.totalorder %v4560_v20, 2  ;;  %vm1420_vm8 = vcmp.gt.s32.totalorder %v4560_v20, 3 }
  0x2f   :  { %3640 = vmatpush3.msra.mxu1 %v216_v7  ;;  %3617 = vmatpush3.msra.mxu0 %v86_v12  ;;  %v4629_v30 = vld [vmem:[%s5463_s5 + $0x40] sm:$0xff]  ;;  %v4638_v31 = vld [vmem:[%s5463_s5 + $0x88] sm:$0xff]  ;;  %v4656_v33 = vld [vmem:[%s5463_s5 + $0x30] sm:$0xff] }
  0x30   :  { %3642 = vmatmul.mubr.msk.f32.vlgmr.msra.gmra.mxu1 %vm97_vm1, %v4487_v9  ;;  %3679 = vmatprep.subr.mxu1 %v4400_v0  ;;  %v4664_v34 = vld [vmem:[%s5463_s5 + $0x80] sm:$0xff]  ;;  %v4679_v36 = vld [vmem:[%s5463_s5 + $0x78] sm:$0xff]  ;;  %v4687_v37 = vld [vmem:[%s5463_s5 + $0x70] sm:$0xff] }
  0x31   :  { %3680 = vmatpush3.msra.mxu1 %v4493_v10  ;;  %3644 = vmatprep.mubr.msk.f32.mxu1 %vm4401_vm0, %v4400_v0  ;;  %v4698_v39 = vld [vmem:[%s5463_s5 + $0x68] sm:$0xff]  ;;  %v4708_v40 = vld [vmem:[%s5463_s5 + $0x60] sm:$0xff] }
  0x32   :  { %3681 = vmatprep.subr.mxu1 %v4400_v0  ;;  %3619 = vmatmul.mubr.msk.f32.vlgmr.msra.gmra.mxu0 %vm97_vm1, %v4487_v9  ;;  %v3248_v43 = vld [vmem:[%s5462_s4 + $0x1] ss:$0 sm:$0xff]  ;;  %v3240_v53 = vld [vmem:[%s5462_s4] ss:$0 sm:$0xff] }
  0x33   :  { %3682 = vmatpush3.msra.mxu1 %v4502_v11  ;;  %3656 = vmatprep.subr.mxu0 %v4400_v0  ;;  %v3255_v48 = vld [vmem:[%s5464_s6 + $0x1] ss:$0 sm:$0xff]  ;;  %v3246_v60 = vld [vmem:[%s5464_s6] ss:$0 sm:$0xff] }
  0x34   :  { %3645 = vmatmul.mubr.msk.f32.gmra.mxu1 %vm97_vm1, %v4510_v13  ;;  %3683 = vmatprep.subr.mxu1 %v4400_v0 }
  0x35   :  { %3647 = vmatprep.mubr.msk.f32.mxu1 %vm4401_vm0, %v4400_v0  ;;  %3684 = vmatpush3.msra.mxu1 %v4517_v14 }
  0x36   :  { %3685 = vmatprep.subr.mxu1 %v4400_v0  ;;  %3621 = vmatprep.mubr.msk.f32.mxu0 %vm4401_vm0, %v4400_v0 }
  0x37   :  { %3686 = vmatpush3.msra.mxu1 %v4526_v15  ;;  %3657 = vmatpush3.msra.mxu0 %v335_v17 }
  0x38   :  { %3648 = vmatmul.mubr.msk.f32.gmra.mxu1 %vm97_vm1, %v4533_v16  ;;  %3622 = vmatmul.mubr.msk.f32.gmra.mxu0 %vm97_vm1, %v4510_v13 }
  0x39   :  { %3650 = vmatprep.mubr.msk.f32.mxu1 %vm4401_vm0, %v4400_v0  ;;  %3687 = vmatprep.subr.mxu1 %v4400_v0 }
  0x3a   :  { %3688 = vmatpush3.msra.mxu1 %v4548_v18  ;;  %3624 = vmatprep.mubr.msk.f32.mxu0 %vm4401_vm0, %v4400_v0 }
  0x3b   :  { %3658 = vmatprep.subr.mxu0 %v4400_v0  ;;  %3689 = vmatprep.subr.mxu1 %v4400_v0 }
  0x3c   :  { %3651 = vmatmul.mubr.msk.f32.gmra.mxu1 %vm97_vm1, %v4555_v19  ;;  %3625 = vmatmul.mubr.msk.f32.gmra.mxu0 %vm97_vm1, %v4533_v16 }
  0x3d   :  { %3653 = vmatprep.mubr.msk.f32.mxu1 %vm4401_vm0, %v4400_v0  ;;  %3690 = vmatpush3.msra.mxu1 %v4571_v21 }
  0x3e   :  { %3659 = vmatpush3.msra.mxu0 %v334_v22  ;;  %3694 = vmatprep.subr.mxu1 %v4400_v0 }
  0x3f   :  { %3627 = vmatprep.mubr.msk.f32.mxu0 %vm4401_vm0, %v4400_v0  ;;  %3660 = vmatprep.subr.mxu0 %v4400_v0 }
  0x40   :  { %3654 = vmatmul.mubr.msk.f32.gmra.mxu1 %vm97_vm1, %v4582_v23  ;;  %3628 = vmatmul.mubr.msk.f32.gmra.mxu0 %vm97_vm1, %v4555_v19 }
  0x41   :  { %3691 = vmatprep.mubr.msk.f32.mxu1 %vm4401_vm0, %v4400_v0  ;;  %700 = vperm.xlu0 %4207, %v698_v24  }
  0x42   :  { %3661 = vmatpush3.msra.mxu0 %v333_v25  ;;  %3630 = vmatprep.mubr.msk.f32.mxu0 %vm4401_vm0, %v4400_v0 }
  0x43   :  { %3662 = vmatprep.subr.mxu0 %v4400_v0 }
  0x44   :  { %3692 = vmatmul.mubr.f32.vlgmr.msra.gmra.mxu1 %v4400_v0  ;;  %3663 = vmatpush3.msra.mxu0 %v332_v27 }
  0x45   :  { %3695 = vmatpush3.msra.mxu1 %v4600_v26  ;;  %3631 = vmatmul.mubr.msk.f32.gmra.mxu0 %vm97_vm1, %v4582_v23 }
  0x46   :  { %3696 = vmatprep.subr.mxu1 %v4400_v0  ;;  %3664 = vmatprep.mubr.msk.f32.mxu0 %vm4401_vm0, %v4400_v0 }
  0x47   :  { %3697 = vmatpush3.msra.mxu1 %v4610_v28  ;;  %3706 = vmatprep.mubr.msk.f32.mxu1 %vm4401_vm0, %v4400_v0 }
  0x48   :  { %3698 = vmatprep.subr.mxu1 %v4400_v0  ;;  %3709 = vmatprep.subr.mxu0 %v4400_v0 }
  0x49   :  { %3699 = vmatpush3.msra.mxu1 %v4618_v29  ;;  %3665 = vmatmul.mubr.msk.f32.vlgmr.msra.gmra.mxu0 %vm97_vm1, %v4487_v9 }
  0x4a   :  { %3700 = vmatprep.subr.mxu1 %v4400_v0  ;;  %3667 = vmatprep.mubr.msk.f32.mxu0 %vm4401_vm0, %v4400_v0 }
  0x4b   :  { %3701 = vmatpush3.msra.mxu1 %v4629_v30  ;;  %3710 = vmatpush3.msra.mxu0 %v4638_v31 }
  0x4c   :  { %3702 = vmatprep.subr.mxu1 %v4400_v0  ;;  %3711 = vmatprep.subr.mxu0 %v4400_v0 }
  0x4d   :  { %3703 = vmatpush3.msra.mxu1 %v4644_v32  ;;  %3668 = vmatmul.mubr.msk.f32.gmra.mxu0 %vm97_vm1, %v4510_v13 }
  0x4e   :  { %3704 = vmatprep.subr.mxu1 %v4400_v0  ;;  %3670 = vmatprep.mubr.msk.f32.mxu0 %vm4401_vm0, %v4400_v0 }
  0x4f   :  { %3705 = vmatpush3.msra.mxu1 %v4656_v33  ;;  %3712 = vmatpush3.msra.mxu0 %v4664_v34 }
  0x50   :  { %3707 = vmatmul.mubr.f32.vlgmr.msra.gmra.mxu1 %v4400_v0  ;;  %3713 = vmatprep.subr.mxu0 %v4400_v0 }
  0x51   :  { %941 = vperm.xlu0 %4207, %v939_v35   ;;  %3671 = vmatmul.mubr.msk.f32.gmra.mxu0 %vm97_vm1, %v4533_v16 }
  0x52   :  { %3724 = vmatprep.subr.mxu1 %v4400_v0  ;;  %3714 = vmatpush3.msra.mxu0 %v4679_v36 }
  0x53   :  { %3673 = vmatprep.mubr.msk.f32.mxu0 %vm4401_vm0, %v4400_v0  ;;  %3715 = vmatprep.subr.mxu0 %v4400_v0 }
  0x54   :  { %3725 = vmatpush3.msra.mxu1 %v4493_v10  ;;  %3716 = vmatpush3.msra.mxu0 %v4687_v37 }
  0x55   :  { %1664 = vperm.xlu0 %4207, %v1662_v38   ;;  %3674 = vmatmul.mubr.msk.f32.gmra.mxu0 %vm97_vm1, %v4555_v19 }
  0x56   :  { %3717 = vmatprep.subr.mxu0 %v4400_v0  ;;  %3676 = vmatprep.mubr.msk.f32.mxu0 %vm4401_vm0, %v4400_v0 }
  0x57   :  { %3718 = vmatpush3.msra.mxu0 %v4698_v39  ;;  %3726 = vmatprep.subr.mxu1 %v4400_v0 }
  0x58   :  { %3719 = vmatprep.subr.mxu0 %v4400_v0  ;;  %3727 = vmatpush3.msra.mxu1 %v4502_v11 }
  0x59   :  { %3720 = vmatpush3.msra.mxu0 %v4708_v40  ;;  %3728 = vmatprep.subr.mxu1 %v4400_v0 }
  0x5a   :  { %3677 = vmatmul.mubr.msk.f32.gmra.mxu0 %vm97_vm1, %v4582_v23  ;;  %3739 = vmatprep.subr.mxu0 %v4400_v0 }
  0x5b   :  { %3721 = vmatprep.mubr.msk.f32.mxu0 %vm4401_vm0, %v4400_v0  ;;  %3729 = vmatpush3.msra.mxu1 %v4517_v14 }
  0x5c   :  { %3736 = vmatprep.mubr.msk.f32.mxu1 %vm4401_vm0, %v4400_v0  ;;  %3730 = vmatprep.subr.mxu1 %v4400_v0 }
  0x5d   :  { %3731 = vmatpush3.msra.mxu1 %v4526_v15 }
  0x5e   :  { %3722 = vmatmul.mubr.f32.vlgmr.msra.gmra.mxu0 %v4400_v0  ;;  %3732 = vmatprep.subr.mxu1 %v4400_v0 }
  0x5f   :  { %3740 = vmatpush3.msra.mxu0 %v4600_v26  ;;  %3733 = vmatpush3.msra.mxu1 %v4548_v18 }
  0x60   :  { %3741 = vmatprep.subr.mxu0 %v4400_v0  ;;  %3734 = vmatprep.subr.mxu1 %v4400_v0 }
  0x61   :  { %3742 = vmatpush3.msra.mxu0 %v4610_v28  ;;  %3735 = vmatpush3.msra.mxu1 %v4571_v21 }
  0x62   :  { %3743 = vmatprep.subr.mxu0 %v4400_v0  ;;  %3751 = vmatprep.mubr.msk.f32.mxu0 %vm4401_vm0, %v4400_v0 }
  0x63   :  { %3744 = vmatpush3.msra.mxu0 %v4618_v29  ;;  %3754 = vmatprep.subr.mxu1 %v4400_v0 }
  0x64   :  { %3745 = vmatprep.subr.mxu0 %v4400_v0 }
  0x65   :  { %3746 = vmatpush3.msra.mxu0 %v4629_v30 }
  0x66   :  { %3747 = vmatprep.subr.mxu0 %v4400_v0 }
  0x67   :  { %3748 = vmatpush3.msra.mxu0 %v4644_v32 }
  0x68   :  { %3749 = vmatprep.subr.mxu0 %v4400_v0 }
  0x69   :  { %3750 = vmatpush3.msra.mxu0 %v4656_v33 }
  0x6a   :  { %3769 = vmatprep.subr.mxu0 %v4400_v0 }
  0xf0   :  { %v294_v41 = vpop.f32.mrf.mxu1 }
  0xf2   :  { %v3643_v42 = vpop.f32.mrf.mxu1  ;;  %v179_v47 = vpop.f32.mrf.mxu0 }
  0xf3   :  { %v180_v3 = vadd.f32 %v3240_v53, %v179_v47  ;;  %v295_v47 = vadd.f32 %v3248_v43, %v294_v41 }
  0xf4   :  { %v299_v44 = vpop.f32.mrf.mxu1  ;;  %v3620_v51 = vpop.f32.mrf.mxu0 }
  0xf5   :  { %v300_v45 = vadd.f32 %v3248_v43, %v299_v44  ;;  %v210_v16 = vadd.f32 %v3246_v60, %v180_v3  ;;  %v3257_v51 = vld [vmem:[%s5462_s4 + $0x2] ss:$0 sm:$0xff] }
  0xf6   :  { %v3646_v46 = vpop.f32.mrf.mxu1 }
  0xf7   :  { %v4754_v49 = vadd.f32 %v3255_v48, %v300_v45 }
  0xf8   :  { %v304_v50 = vpop.f32.mrf.mxu1  ;;  %v184_v55 = vpop.f32.mrf.mxu0 }
  0xf9   :  { %v305_v52 = vadd.f32 %v3248_v43, %v304_v50  ;;  %v185_v56 = vadd.f32 %v3240_v53, %v184_v55 }
  0xfa   :  { %v3649_v54 = vpop.f32.mrf.mxu1  ;;  %v3623_v59 = vpop.f32.mrf.mxu0 }
  0xfb   :  { %v4759_v57 = vadd.f32 %v3255_v48, %v305_v52  ;;  %v4764_v62 = vadd.f32 %v3246_v60, %v185_v56  ;;  %v326_v54 = vadd.f32 %v3255_v48, %v295_v47 }
  0xfc   :  { %v309_v58 = vpop.f32.mrf.mxu1  ;;  %v189_v2 = vpop.f32.mrf.mxu0 }
  0xfd   :  { %v310_v61 = vadd.f32 %v3248_v43, %v309_v58  ;;  %v190_v4 = vadd.f32 %v3240_v53, %v189_v2 }
  0xfe   :  { %v3652_v63 = vpop.f32.mrf.mxu1  ;;  %v3626_v7 = vpop.f32.mrf.mxu0 }
  0xff   :  { %v4766_v5 = vadd.f32 %v3255_v48, %v310_v61  ;;  %v4768_v9 = vadd.f32 %v3246_v60, %v190_v4 }
 0x100   :  { %v314_v6 = vpop.f32.mrf.mxu1  ;;  %v194_v13 = vpop.f32.mrf.mxu0 }
 0x101   :  { %v315_v8 = vadd.f32 %v3248_v43, %v314_v6  ;;  %v195_v17 = vadd.f32 %v3240_v53, %v194_v13  ;;  %v4790_v13 = vld [vmem:[%s5464_s6 + $0x2] ss:$0 sm:$0xff] }
 0x102   :  { %v3655_v12 = vpop.f32.mrf.mxu1  ;;  %v3629_v23 = vpop.f32.mrf.mxu0 }
 0x103   :  { %v4770_v19 = vadd.f32 %v3255_v48, %v315_v8  ;;  %v4772_v25 = vadd.f32 %v3246_v60, %v195_v17 }
 0x104   :  { %v532_v22 = vpop.f32.mrf.mxu1 }
 0x105   :  { %v676_v24 = vadd.f32 %v532_v22, %v210_v16  ;;  %v199_v35 = vpop.f32.mrf.mxu0 }
 0x106   :  { %v3693_v27 = vpop.f32.mrf.mxu1  ;;  %v200_v42 = vadd.f32 %v3240_v53, %v199_v35 }
 0x107   :  { %v3277_v38 = vmul.f32 -1.442695, %v676_v24  ;;  %v3632_v44 = vpop.f32.mrf.mxu0 }
 0x108   :  { %v4774_v45 = vadd.f32 %v3246_v60, %v200_v42 }
 0x109   :  { %4209 = vpow2.f32 %v3277_v38  ;;  %v410_v46 = vpop.f32.mrf.mxu0 }
 0x10a   :  { %v411_v27 = vadd.f32 %v3257_v51, %v410_v46  ;;  %v1180_v46 = vsel %vm1179_vm7, 1, %v4402_v1 }
 0x10b   :  { %v3666_v50 = vpop.f32.mrf.mxu0  ;;  %1182 = vperm.xlu1 %4208, %v1180_v46  }
 0x10d   :  { %v415_v52 = vpop.f32.mrf.mxu0 }
 0x10e   :  { %v4779_v55 = vadd.f32 %v3257_v51, %v415_v52 }
 0x10f   :  { %v3669_v58 = vpop.f32.mrf.mxu0 }
 0x110   :  { %v602_v56 = vpop.f32.mrf.mxu1 }
 0x111   :  { %v683_v59 = vadd.f32 %v602_v56, %v326_v54  ;;  %v420_v53 = vpop.f32.mrf.mxu0  ;;  %v4793_v54 = vpop.permute.xlu0 %700 }
 0x112   :  { %v3708_v61 = vpop.f32.mrf.mxu1  ;;  %v4781_v2 = vadd.f32 %v3257_v51, %v420_v53  ;;  %vm702_vm5 = vcmp.eq.s32.totalorder %v4793_v54, 1 }
 0x113   :  { %v3278_v63 = vmul.f32 -1.442695, %v683_v59  ;;  %v3672_v60 = vpop.f32.mrf.mxu0 }
 0x115   :  { %4211 = vpow2.f32 %v3278_v63  ;;  %v425_v43 = vpop.f32.mrf.mxu0 }
 0x116   :  { %v4210_v41 = vpop.eup %4209  ;;  %v4783_v4 = vadd.f32 %v3257_v51, %v425_v43 }
 0x117   :  { %v680_v3 = vadd.f32 1.0, %v4210_v41  ;;  %v3675_v6 = vpop.f32.mrf.mxu0 }
 0x119   :  { %4213 = vrcp.f32 %v680_v3 }
 0x11a   :  { %v430_v48 = vpop.f32.mrf.mxu0 }
 0x11b   :  { %v4785_v7 = vadd.f32 %v3257_v51, %v430_v48  ;;  %v1421_v51 = vsel %vm1420_vm8, 1, %v4402_v1 }
 0x11c   :  { %v3678_v8 = vpop.f32.mrf.mxu0  ;;  %1423 = vperm.xlu1 %4208, %v1421_v51  }
 0x11e   :  { %v672_v12 = vpop.f32.mrf.mxu0 }
 0x11f   :  { %v673_v23 = vadd.f32 %v4790_v13, %v672_v12 }
 0x120   :  { %v3723_v16 = vpop.f32.mrf.mxu0 }
 0x122   :  { %v4212_v17 = vpop.eup %4211 }
 0x123   :  { %v687_v22 = vadd.f32 1.0, %v4212_v17 }
 0x125   :  { %4215 = vrcp.f32 %v687_v22 }
 0x126   :  { %v4214_v24 = vpop.eup %4213 }
 0x127   :  { %v690_v35 = vmul.f32 %v4214_v24, %v673_v23 }
 0x129   :  { %v691_v38 = vadd.f32 %v690_v35, %v411_v27 }
 0x12b   :  { %4217 = vtanh.f32 %v691_v38  ;;  %v4857_v38 = vpop.permute.xlu0 %941 }
 0x12c   :  { %vm943_vm9 = vcmp.eq.s32.totalorder %v4857_v38, 1 }
 0x132   :  { %v4216_v42 = vpop.eup %4215 }
 0x133   :  { %v693_v44 = vsub.f32 1.0, %v4216_v42  ;;  %v695_v52 = vmul.f32 0.0, %v4216_v42 }
 0x138   :  { %v4218_v47 = vpop.eup %4217 }
 0x139   :  { %v694_v50 = vmul.f32 %v4218_v47, %v693_v44 }
 0x13b   :  { %v696_v56 = vadd.f32 %v695_v52, %v694_v50 }
 0x13d   :  { %v4798_v58 = vsel %vm702_vm5, %v696_v56, 0.0 }
 0x13e   :  { %3737 = vmatmul.mubr.msk.f32.vlgmr.msra.gmra.mxu1 %vm462_vm6, %v4798_v58  ;;  %3752 = vmatmul.mubr.msk.f32.vlgmr.msra.gmra.mxu0 %vm462_vm6, %v4798_v58 }
 0x13f   :  { %3755 = vmatpush3.msra.mxu1 %v4638_v31  ;;  %3766 = vmatprep.mubr.msk.f32.mxu1 %vm4401_vm0, %v4400_v0 }
 0x140   :  { %3756 = vmatprep.subr.mxu1 %v4400_v0  ;;  %3770 = vmatpush3.msra.mxu0 %v4493_v10 }
 0x141   :  { %3757 = vmatpush3.msra.mxu1 %v4664_v34  ;;  %3771 = vmatprep.subr.mxu0 %v4400_v0 }
 0x142   :  { %3758 = vmatprep.subr.mxu1 %v4400_v0  ;;  %3772 = vmatpush3.msra.mxu0 %v4502_v11 }
 0x143   :  { %3759 = vmatpush3.msra.mxu1 %v4679_v36  ;;  %3773 = vmatprep.subr.mxu0 %v4400_v0 }
 0x144   :  { %3760 = vmatprep.subr.mxu1 %v4400_v0  ;;  %3774 = vmatpush3.msra.mxu0 %v4517_v14 }
 0x145   :  { %3761 = vmatpush3.msra.mxu1 %v4687_v37  ;;  %3775 = vmatprep.subr.mxu0 %v4400_v0 }
 0x146   :  { %3762 = vmatprep.subr.mxu1 %v4400_v0  ;;  %3776 = vmatpush3.msra.mxu0 %v4526_v15 }
 0x147   :  { %3763 = vmatpush3.msra.mxu1 %v4698_v39  ;;  %3777 = vmatprep.subr.mxu0 %v4400_v0 }
 0x148   :  { %3764 = vmatprep.subr.mxu1 %v4400_v0  ;;  %3778 = vmatpush3.msra.mxu0 %v4548_v18 }
 0x149   :  { %3765 = vmatpush3.msra.mxu1 %v4708_v40  ;;  %3779 = vmatprep.subr.mxu0 %v4400_v0 }
 0x14a   :  { %3767 = vmatmul.mubr.msk.f32.vlgmr.msra.gmra.mxu1 %vm462_vm6, %v4798_v58  ;;  %3784 = vmatprep.subr.mxu1 %v4400_v0 }
 0x14b   :  { %3785 = vmatpush3.msra.mxu1 %v4600_v26  ;;  %3780 = vmatpush3.msra.mxu0 %v4571_v21 }
 0x14c   :  { %3786 = vmatprep.subr.mxu1 %v4400_v0  ;;  %3781 = vmatprep.mubr.msk.f32.mxu0 %vm4401_vm0, %v4400_v0 }
 0x14d   :  { %3787 = vmatpush3.msra.mxu1 %v4610_v28  ;;  %3796 = vmatprep.mubr.msk.f32.mxu1 %vm4401_vm0, %v4400_v0 }
 0x14e   :  { %3788 = vmatprep.subr.mxu1 %v4400_v0  ;;  %3799 = vmatprep.subr.mxu0 %v4400_v0 }
 0x14f   :  { %3789 = vmatpush3.msra.mxu1 %v4618_v29 }
 0x150   :  { %3790 = vmatprep.subr.mxu1 %v4400_v0 }
 0x151   :  { %3791 = vmatpush3.msra.mxu1 %v4629_v30 }
 0x152   :  { %3792 = vmatprep.subr.mxu1 %v4400_v0 }
 0x153   :  { %3793 = vmatpush3.msra.mxu1 %v4644_v32 }
 0x154   :  { %3794 = vmatprep.subr.mxu1 %v4400_v0 }
 0x155   :  { %3795 = vmatpush3.msra.mxu1 %v4656_v33 }
 0x156   :  { %3814 = vmatprep.subr.mxu1 %v4400_v0 }
 0x1fe   :  { %v773_v59 = vpop.f32.mrf.mxu1  ;;  %v843_v61 = vpop.f32.mrf.mxu0 }
 0x1ff   :  { %v917_v53 = vadd.f32 %v773_v59, %v4764_v62  ;;  %v924_v43 = vadd.f32 %v843_v61, %v4754_v49 }
 0x200   :  { %v3738_v63 = vpop.f32.mrf.mxu1  ;;  %v3753_v60 = vpop.f32.mrf.mxu0 }
 0x201   :  { %v3282_v41 = vmul.f32 -1.442695, %v917_v53  ;;  %v3283_v3 = vmul.f32 -1.442695, %v924_v43 }
 0x203   :  { %4219 = vpow2.f32 %v3282_v41 }
 0x204   :  { %4221 = vpow2.f32 %v3283_v3 }
 0x20a   :  { %v913_v6 = vpop.f32.mrf.mxu1 }
 0x20b   :  { %v914_v16 = vadd.f32 %v4790_v13, %v913_v6 }
 0x20c   :  { %v3768_v48 = vpop.f32.mrf.mxu1 }
 0x210   :  { %v4220_v20 = vpop.eup %4219 }
 0x211   :  { %v921_v8 = vadd.f32 1.0, %v4220_v20  ;;  %v4222_v12 = vpop.eup %4221 }
 0x212   :  { %v928_v1 = vadd.f32 1.0, %v4222_v12  ;;  %v4917_v12 = vpop.permute.xlu1 %1182 }
 0x213   :  { %4223 = vrcp.f32 %v921_v8  ;;  %vm1184_vm10 = vcmp.eq.s32.totalorder %v4917_v12, 1 }
 0x214   :  { %4225 = vrcp.f32 %v928_v1 }
 0x220   :  { %v4224_v17 = vpop.eup %4223 }
 0x221   :  { %v931_v62 = vmul.f32 %v4224_v17, %v914_v16  ;;  %v4226_v23 = vpop.eup %4225 }
 0x222   :  { %v934_v24 = vsub.f32 1.0, %v4226_v23  ;;  %v936_v35 = vmul.f32 %v4226_v23, %v4798_v58 }
 0x223   :  { %v932_v22 = vadd.f32 %v931_v62, %v4779_v55 }
 0x225   :  { %4227 = vtanh.f32 %v932_v22 }
 0x232   :  { %v4228_v49 = vpop.eup %4227 }
 0x233   :  { %v935_v27 = vmul.f32 %v4228_v49, %v934_v24 }
 0x235   :  { %v937_v42 = vadd.f32 %v936_v35, %v935_v27 }
 0x237   :  { %v4863_v44 = vsel %vm943_vm9, %v937_v42, %v4798_v58  ;;  %v4978_v42 = vpop.permute.xlu1 %1423 }
 0x238   :  { %3782 = vmatmul.mubr.msk.f32.vlgmr.msra.gmra.mxu0 %vm462_vm6, %v4863_v44  ;;  %3797 = vmatmul.mubr.msk.f32.vlgmr.msra.gmra.mxu1 %vm462_vm6, %v4863_v44  ;;  %vm1425_vm11 = vcmp.eq.s32.totalorder %v4978_v42, 1 }
 0x239   :  { %3800 = vmatpush3.msra.mxu0 %v4638_v31  ;;  %3811 = vmatprep.mubr.msk.f32.mxu0 %vm4401_vm0, %v4400_v0 }
 0x23a   :  { %3801 = vmatprep.subr.mxu0 %v4400_v0  ;;  %3815 = vmatpush3.msra.mxu1 %v4493_v10 }
 0x23b   :  { %3802 = vmatpush3.msra.mxu0 %v4664_v34  ;;  %3816 = vmatprep.subr.mxu1 %v4400_v0 }
 0x23c   :  { %3803 = vmatprep.subr.mxu0 %v4400_v0  ;;  %3817 = vmatpush3.msra.mxu1 %v4502_v11 }
 0x23d   :  { %3804 = vmatpush3.msra.mxu0 %v4679_v36  ;;  %3818 = vmatprep.subr.mxu1 %v4400_v0 }
 0x23e   :  { %3805 = vmatprep.subr.mxu0 %v4400_v0  ;;  %3819 = vmatpush3.msra.mxu1 %v4517_v14 }
 0x23f   :  { %3806 = vmatpush3.msra.mxu0 %v4687_v37  ;;  %3820 = vmatprep.subr.mxu1 %v4400_v0 }
 0x240   :  { %3807 = vmatprep.subr.mxu0 %v4400_v0  ;;  %3821 = vmatpush3.msra.mxu1 %v4526_v15 }
 0x241   :  { %3808 = vmatpush3.msra.mxu0 %v4698_v39  ;;  %3822 = vmatprep.subr.mxu1 %v4400_v0 }
 0x242   :  { %3809 = vmatprep.subr.mxu0 %v4400_v0  ;;  %3823 = vmatpush3.msra.mxu1 %v4548_v18 }
 0x243   :  { %3810 = vmatpush3.msra.mxu0 %v4708_v40  ;;  %3824 = vmatprep.subr.mxu1 %v4400_v0 }
 0x244   :  { %3812 = vmatmul.mubr.msk.f32.vlgmr.msra.gmra.mxu0 %vm462_vm6, %v4863_v44  ;;  %3829 = vmatprep.subr.mxu0 %v4400_v0 }
 0x245   :  { %3830 = vmatpush3.msra.mxu0 %v4600_v26  ;;  %3825 = vmatpush3.msra.mxu1 %v4571_v21 }
 0x246   :  { %3831 = vmatprep.subr.mxu0 %v4400_v0  ;;  %3826 = vmatprep.mubr.msk.f32.mxu1 %vm4401_vm0, %v4400_v0 }
 0x247   :  { %3832 = vmatpush3.msra.mxu0 %v4610_v28  ;;  %3841 = vmatprep.mubr.msk.f32.mxu0 %vm4401_vm0, %v4400_v0 }
 0x248   :  { %3833 = vmatprep.subr.mxu0 %v4400_v0  ;;  %3844 = vmatprep.subr.mxu1 %v4400_v0 }
 0x249   :  { %3834 = vmatpush3.msra.mxu0 %v4618_v29 }
 0x24a   :  { %3835 = vmatprep.subr.mxu0 %v4400_v0 }
 0x24b   :  { %3836 = vmatpush3.msra.mxu0 %v4629_v30 }
 0x24c   :  { %3837 = vmatprep.subr.mxu0 %v4400_v0 }
 0x24d   :  { %3838 = vmatpush3.msra.mxu0 %v4644_v32 }
 0x24e   :  { %3839 = vmatprep.subr.mxu0 %v4400_v0 }
 0x24f   :  { %3840 = vmatpush3.msra.mxu0 %v4656_v33 }
 0x250   :  { %3859 = vmatprep.subr.mxu0 %v4400_v0 }
 0x2f8   :  { %v1014_v55 = vpop.f32.mrf.mxu0  ;;  %v1084_v47 = vpop.f32.mrf.mxu1 }
 0x2f9   :  { %v1158_v50 = vadd.f32 %v1014_v55, %v4768_v9  ;;  %v1165_v51 = vadd.f32 %v1084_v47, %v4759_v57 }
 0x2fa   :  { %v3783_v52 = vpop.f32.mrf.mxu0  ;;  %v3798_v56 = vpop.f32.mrf.mxu1 }
 0x2fb   :  { %v3287_v46 = vmul.f32 -1.442695, %v1158_v50  ;;  %v3288_v59 = vmul.f32 -1.442695, %v1165_v51  ;;  %v1677_v52 = vld [vmem:[#allocation5 + $0x18] sm:$0xff]  ;;  %v1675_v56 = vld [vmem:[#allocation5 + $0x8] sm:$0xff] }
 0x2fc   :  { %v1803_v51 = vld [vmem:[#allocation5 + $0x20] sm:$0xff] }
 0x2fd   :  { %4229 = vpow2.f32 %v3287_v46  ;;  %v1804_v46 = vld [vmem:[#allocation5 + $0x28] sm:$0xff] }
 0x2fe   :  { %4231 = vpow2.f32 %v3288_v59  ;;  %v1921_v59 = vld [vmem:[#allocation5 + $0x50] sm:$0xff] }
 0x304   :  { %v1154_v61 = vpop.f32.mrf.mxu0 }
 0x305   :  { %v1155_v3 = vadd.f32 %v4790_v13, %v1154_v61  ;;  %v5035_v61 = vld [vmem:[#allocation7 + $0x28] sm:$0xff] }
 0x306   :  { %v3813_v53 = vpop.f32.mrf.mxu0 }
 0x307   :  { %v5042_v53 = vld [vmem:[#allocation7 + $0x20] sm:$0xff] }
 0x30a   :  { %v4230_v63 = vpop.eup %4229 }
 0x30b   :  { %v1162_v60 = vadd.f32 1.0, %v4230_v63  ;;  %v4232_v41 = vpop.eup %4231  ;;  %v5050_v63 = vld [vmem:[%s5459_s1 + $0x10] sm:$0xff] }
 0x30c   :  { %v1169_v43 = vadd.f32 1.0, %v4232_v41  ;;  %v5063_v41 = vld [vmem:[#allocation7 + $0x10] sm:$0xff] }
 0x30d   :  { %4233 = vrcp.f32 %v1162_v60  ;;  %v5053_v60 = vld [vmem:[#allocation7 + $0x18] sm:$0xff] }
 0x30e   :  { %4235 = vrcp.f32 %v1169_v43  ;;  %v1672_v43 = vld [vmem:[%s5459_s1 + $0x18] sm:$0xff] }
 0x31a   :  { %v4234_v6 = vpop.eup %4233 }
 0x31b   :  { %v1172_v9 = vmul.f32 %v4234_v6, %v1155_v3  ;;  %v4236_v20 = vpop.eup %4235  ;;  %v5072_v3 = vld [vmem:[#allocation7 + $0x8] sm:$0xff] }
 0x31c   :  { %v1175_v8 = vsub.f32 1.0, %v4236_v20  ;;  %v1177_v16 = vmul.f32 %v4236_v20, %v4863_v44  ;;  %v1920_v6 = vld [vmem:[#allocation5 + $0x48] sm:$0xff]  ;;  %v1919_v20 = vld [vmem:[#allocation5 + $0x40] sm:$0xff] }
 0x31d   :  { %v1173_v48 = vadd.f32 %v1172_v9, %v4781_v2  ;;  %v5080_v9 = vld [vmem:[#allocation7] sm:$0xff] }
 0x31f   :  { %4237 = vtanh.f32 %v1173_v48  ;;  %v1673_v48 = vld [vmem:[%s5459_s1 + $0x20] sm:$0xff] }
 0x32c   :  { %v4238_v57 = vpop.eup %4237 }
 0x32d   :  { %v1176_v1 = vmul.f32 %v4238_v57, %v1175_v8  ;;  %v5100_v8 = vld [vmem:[#allocation7 + $0x88] sm:$0xff]  ;;  %v5108_v57 = vld [vmem:[#allocation7 + $0x80] sm:$0xff] }
 0x32f   :  { %v1178_v17 = vadd.f32 %v1177_v16, %v1176_v1  ;;  %v5110_v1 = vld [vmem:[#allocation7 + $0x58] sm:$0xff]  ;;  %v5117_v16 = vld [vmem:[#allocation7 + $0x50] sm:$0xff] }
 0x331   :  { %v4924_v62 = vsel %vm1184_vm10, %v1178_v17, %v4863_v44  ;;  %v5124_v17 = vld [vmem:[#allocation7 + $0x48] sm:$0xff] }
 0x332   :  { %3827 = vmatmul.mubr.msk.f32.vlgmr.msra.gmra.mxu1 %vm462_vm6, %v4924_v62  ;;  %3842 = vmatmul.mubr.msk.f32.vlgmr.msra.gmra.mxu0 %vm462_vm6, %v4924_v62 }
 0x333   :  { %3845 = vmatpush3.msra.mxu1 %v4638_v31  ;;  %3856 = vmatprep.mubr.msk.f32.mxu1 %vm4401_vm0, %v4400_v0 }
 0x334   :  { %3846 = vmatprep.subr.mxu1 %v4400_v0  ;;  %3860 = vmatpush3.msra.mxu0 %v4493_v10 }
 0x335   :  { %3847 = vmatpush3.msra.mxu1 %v4664_v34  ;;  %3861 = vmatprep.subr.mxu0 %v4400_v0 }
 0x336   :  { %3848 = vmatprep.subr.mxu1 %v4400_v0  ;;  %3862 = vmatpush3.msra.mxu0 %v4502_v11 }
 0x337   :  { %3849 = vmatpush3.msra.mxu1 %v4679_v36  ;;  %3863 = vmatprep.subr.mxu0 %v4400_v0 }
 0x338   :  { %3850 = vmatprep.subr.mxu1 %v4400_v0  ;;  %3864 = vmatpush3.msra.mxu0 %v4517_v14 }
 0x339   :  { %3851 = vmatpush3.msra.mxu1 %v4687_v37  ;;  %3865 = vmatprep.subr.mxu0 %v4400_v0 }
 0x33a   :  { %3852 = vmatprep.subr.mxu1 %v4400_v0  ;;  %3866 = vmatpush3.msra.mxu0 %v4526_v15 }
 0x33b   :  { %3853 = vmatpush3.msra.mxu1 %v4698_v39  ;;  %3867 = vmatprep.subr.mxu0 %v4400_v0 }
 0x33c   :  { %3854 = vmatprep.subr.mxu1 %v4400_v0  ;;  %3868 = vmatpush3.msra.mxu0 %v4548_v18 }
 0x33d   :  { %3855 = vmatpush3.msra.mxu1 %v4708_v40  ;;  %3869 = vmatprep.subr.mxu0 %v4400_v0 }
 0x33e   :  { %3857 = vmatmul.mubr.msk.f32.vlgmr.msra.gmra.mxu1 %vm462_vm6, %v4924_v62  ;;  %3874 = vmatprep.subr.mxu1 %v4400_v0 }
 0x33f   :  { %3875 = vmatpush3.msra.mxu1 %v4600_v26  ;;  %3870 = vmatpush3.msra.mxu0 %v4571_v21 }
 0x340   :  { %3876 = vmatprep.subr.mxu1 %v4400_v0  ;;  %3871 = vmatprep.mubr.msk.f32.mxu0 %vm4401_vm0, %v4400_v0 }
 0x341   :  { %3877 = vmatpush3.msra.mxu1 %v4610_v28  ;;  %3886 = vmatprep.mubr.msk.f32.mxu1 %vm4401_vm0, %v4400_v0 }
 0x342   :  { %3878 = vmatprep.subr.mxu1 %v4400_v0  ;;  %3889 = vmatprep.subr.mxu0 %v4400_v0 }
 0x343   :  { %3879 = vmatpush3.msra.mxu1 %v4618_v29 }
 0x344   :  { %3880 = vmatprep.subr.mxu1 %v4400_v0 }
 0x345   :  { %3881 = vmatpush3.msra.mxu1 %v4629_v30 }
 0x346   :  { %3882 = vmatprep.subr.mxu1 %v4400_v0 }
 0x347   :  { %3883 = vmatpush3.msra.mxu1 %v4644_v32 }
 0x348   :  { %3884 = vmatprep.subr.mxu1 %v4400_v0 }
 0x349   :  { %3885 = vmatpush3.msra.mxu1 %v4656_v33 }
 0x34a   :  { %3904 = vmatprep.subr.mxu1 %v4400_v0 }
 0x3f2   :  { %v1255_v10 = vpop.f32.mrf.mxu1  ;;  %v1325_v11 = vpop.f32.mrf.mxu0 }
 0x3f3   :  { %v1399_v14 = vadd.f32 %v1255_v10, %v4772_v25  ;;  %v1406_v26 = vadd.f32 %v1325_v11, %v4766_v5  ;;  %v5134_v10 = vld [vmem:[#allocation7 + $0x40] sm:$0xff]  ;;  %v5140_v11 = vld [vmem:[#allocation7 + $0x38] sm:$0xff] }
 0x3f4   :  { %v3828_v15 = vpop.f32.mrf.mxu1  ;;  %v3843_v18 = vpop.f32.mrf.mxu0 }
 0x3f5   :  { %v3292_v21 = vmul.f32 -1.442695, %v1399_v14  ;;  %v3293_v28 = vmul.f32 -1.442695, %v1406_v26  ;;  %v5144_v14 = vld [vmem:[#allocation7 + $0x70] sm:$0xff]  ;;  %v5157_v18 = vld [vmem:[#allocation7 + $0x68] sm:$0xff] }
 0x3f6   :  { %v5150_v15 = vld [vmem:[#allocation7 + $0x30] sm:$0xff] }
 0x3f7   :  { %4239 = vpow2.f32 %v3292_v21  ;;  %v5164_v21 = vld [vmem:[#allocation7 + $0x60] sm:$0xff] }
 0x3f8   :  { %4241 = vpow2.f32 %v3293_v28 }
 0x3fe   :  { %v1395_v29 = vpop.f32.mrf.mxu1 }
 0x3ff   :  { %v1396_v23 = vadd.f32 %v4790_v13, %v1395_v29 }
 0x400   :  { %v3858_v30 = vpop.f32.mrf.mxu1 }
 0x404   :  { %v4240_v32 = vpop.eup %4239 }
 0x405   :  { %v1403_v2 = vadd.f32 1.0, %v4240_v32  ;;  %v4242_v33 = vpop.eup %4241 }
 0x406   :  { %v1410_v22 = vadd.f32 1.0, %v4242_v33 }
 0x407   :  { %4243 = vrcp.f32 %v1403_v2 }
 0x408   :  { %4245 = vrcp.f32 %v1410_v22 }
 0x414   :  { %v4244_v24 = vpop.eup %4243 }
 0x415   :  { %v1413_v25 = vmul.f32 %v4244_v24, %v1396_v23  ;;  %v4246_v27 = vpop.eup %4245 }
 0x416   :  { %v1416_v35 = vsub.f32 1.0, %v4246_v27  ;;  %v1418_v55 = vmul.f32 %v4246_v27, %v4924_v62  ;;  %v3299_v27 = vld [vmem:[%s5466_s8] ss:$0 sm:$0xff] }
 0x417   :  { %v1414_v49 = vadd.f32 %v1413_v25, %v4783_v4  ;;  %v1676_v4 = vld [vmem:[#allocation5 + $0x10] sm:$0xff] }
 0x419   :  { %4247 = vtanh.f32 %v1414_v49 }
 0x426   :  { %v4248_v5 = vpop.eup %4247 }
 0x427   :  { %v1417_v44 = vmul.f32 %v4248_v5, %v1416_v35 }
 0x429   :  { %v1419_v47 = vadd.f32 %v1418_v55, %v1417_v44 }
 0x42b   :  { %v4985_v50 = vsel %vm1425_vm11, %v1419_v47, %v4924_v62  ;;  %v5128_v62 = vld [vmem:[#allocation7 + $0x78] sm:$0xff] }
 0x42c   :  { %3872 = vmatmul.mubr.msk.f32.vlgmr.msra.gmra.mxu0 %vm462_vm6, %v4985_v50  ;;  %3887 = vmatmul.mubr.msk.f32.vlgmr.msra.gmra.mxu1 %vm462_vm6, %v4985_v50 }
 0x42d   :  { %3890 = vmatpush3.msra.mxu0 %v4638_v31  ;;  %3901 = vmatprep.mubr.msk.f32.mxu0 %vm4401_vm0, %v4400_v0  ;;  %v1674_v31 = vld [vmem:[#allocation5] sm:$0xff] }
 0x42e   :  { %3891 = vmatprep.subr.mxu0 %v4400_v0  ;;  %3905 = vmatpush3.msra.mxu1 %v1677_v52 }
 0x42f   :  { %3892 = vmatpush3.msra.mxu0 %v4664_v34  ;;  %3906 = vmatprep.subr.mxu1 %v4400_v0  ;;  %v5008_v34 = vld [vmem:[%s5459_s1] sm:$0xff] }
 0x430   :  { %3893 = vmatprep.subr.mxu0 %v4400_v0  ;;  %3907 = vmatpush3.msra.mxu1 %v1676_v4 }
 0x431   :  { %3894 = vmatpush3.msra.mxu0 %v4679_v36  ;;  %3908 = vmatprep.subr.mxu1 %v4400_v0  ;;  %v1806_v36 = vld [vmem:[#allocation5 + $0x38] sm:$0xff] }
 0x432   :  { %3895 = vmatprep.subr.mxu0 %v4400_v0  ;;  %3909 = vmatpush3.msra.mxu1 %v1675_v56 }
 0x433   :  { %3896 = vmatpush3.msra.mxu0 %v4687_v37  ;;  %3910 = vmatprep.subr.mxu1 %v4400_v0  ;;  %v1922_v37 = vld [vmem:[#allocation5 + $0x58] sm:$0xff] }
 0x434   :  { %3897 = vmatprep.subr.mxu0 %v4400_v0  ;;  %3911 = vmatpush3.msra.mxu1 %v1674_v31 }
 0x435   :  { %3898 = vmatpush3.msra.mxu0 %v4698_v39  ;;  %3912 = vmatprep.mubr.msk.f32.mxu1 %vm4401_vm0, %v4400_v0  ;;  %v1805_v39 = vld [vmem:[#allocation5 + $0x30] sm:$0xff] }
 0x436   :  { %3899 = vmatprep.subr.mxu0 %v4400_v0  ;;  %3913 = vmatmul.mubr.msk.f32.vlgmr.msra.gmra.mxu1 %vm97_vm1, %v5008_v34 }
 0x437   :  { %3900 = vmatpush3.msra.mxu0 %v4708_v40  ;;  %3950 = vmatprep.subr.mxu1 %v4400_v0  ;;  %v5026_v40 = vld [vmem:[%s5459_s1 + $0x8] sm:$0xff] }
 0x438   :  { %3902 = vmatmul.mubr.msk.f32.vlgmr.msra.gmra.mxu0 %vm462_vm6, %v4985_v50  ;;  %3927 = vmatprep.subr.mxu0 %v4400_v0 }
 0x439   :  { %3928 = vmatpush3.msra.mxu0 %v1806_v36  ;;  %3935 = vmatprep.mubr.msk.f32.mxu0 %vm4401_vm0, %v4400_v0 }
 0x43a   :  { %3929 = vmatprep.subr.mxu0 %v4400_v0  ;;  %3951 = vmatpush3.msra.mxu1 %v1922_v37 }
 0x43b   :  { %3930 = vmatpush3.msra.mxu0 %v1805_v39  ;;  %3915 = vmatprep.mubr.msk.f32.mxu1 %vm4401_vm0, %v4400_v0 }
 0x43c   :  { %3931 = vmatprep.subr.mxu0 %v4400_v0  ;;  %3916 = vmatmul.mubr.msk.f32.gmra.mxu1 %vm97_vm1, %v5026_v40 }
 0x43d   :  { %3932 = vmatpush3.msra.mxu0 %v1804_v46  ;;  %3952 = vmatprep.subr.mxu1 %v4400_v0 }
 0x43e   :  { %3933 = vmatprep.subr.mxu0 %v4400_v0  ;;  %3918 = vmatprep.mubr.msk.f32.mxu1 %vm4401_vm0, %v4400_v0 }
 0x43f   :  { %3934 = vmatpush3.msra.mxu0 %v1803_v51  ;;  %3953 = vmatpush3.msra.mxu1 %v1921_v59  ;;  %v3314_v51 = vld [vmem:[%s5468_s10 + $0x1] ss:$0 sm:$0xff] }
 0x440   :  { %3936 = vmatmul.mubr.msk.f32.vlgmr.msra.gmra.mxu0 %vm97_vm1, %v5008_v34  ;;  %3973 = vmatprep.subr.mxu0 %v4400_v0 }
 0x441   :  { %3974 = vmatpush3.msra.mxu0 %v5035_v61  ;;  %3938 = vmatprep.mubr.msk.f32.mxu0 %vm4401_vm0, %v4400_v0 }
 0x442   :  { %3975 = vmatprep.subr.mxu0 %v4400_v0  ;;  %3919 = vmatmul.mubr.msk.f32.gmra.mxu1 %vm97_vm1, %v5050_v63 }
 0x443   :  { %3976 = vmatpush3.msra.mxu0 %v5042_v53  ;;  %3921 = vmatprep.mubr.msk.f32.mxu1 %vm4401_vm0, %v4400_v0 }
 0x444   :  { %3939 = vmatmul.mubr.msk.f32.gmra.mxu0 %vm97_vm1, %v5026_v40  ;;  %3977 = vmatprep.subr.mxu0 %v4400_v0 }
 0x445   :  { %3941 = vmatprep.mubr.msk.f32.mxu0 %vm4401_vm0, %v4400_v0  ;;  %3978 = vmatpush3.msra.mxu0 %v5053_v60 }
 0x446   :  { %3979 = vmatprep.subr.mxu0 %v4400_v0  ;;  %3954 = vmatprep.subr.mxu1 %v4400_v0 }
 0x447   :  { %3980 = vmatpush3.msra.mxu0 %v5063_v41  ;;  %3922 = vmatmul.mubr.msk.f32.gmra.mxu1 %vm97_vm1, %v1672_v43 }
 0x448   :  { %3942 = vmatmul.mubr.msk.f32.gmra.mxu0 %vm97_vm1, %v5050_v63  ;;  %3981 = vmatprep.subr.mxu0 %v4400_v0 }
 0x449   :  { %3944 = vmatprep.mubr.msk.f32.mxu0 %vm4401_vm0, %v4400_v0  ;;  %3982 = vmatpush3.msra.mxu0 %v5072_v3 }
 0x44a   :  { %3983 = vmatprep.subr.mxu0 %v4400_v0  ;;  %3955 = vmatpush3.msra.mxu1 %v1920_v6 }
 0x44b   :  { %3984 = vmatpush3.msra.mxu0 %v5080_v9  ;;  %3924 = vmatprep.mubr.msk.f32.mxu1 %vm4401_vm0, %v4400_v0 }
 0x44c   :  { %3945 = vmatmul.mubr.msk.f32.gmra.mxu0 %vm97_vm1, %v1672_v43  ;;  %3988 = vmatprep.subr.mxu0 %v4400_v0 }
 0x44d   :  { %3947 = vmatprep.mubr.msk.f32.mxu0 %vm4401_vm0, %v4400_v0  ;;  %3925 = vmatmul.mubr.msk.f32.gmra.mxu1 %vm97_vm1, %v1673_v48 }
 0x44e   :  { %3956 = vmatprep.subr.mxu1 %v4400_v0  ;;  %3958 = vmatprep.mubr.msk.f32.mxu1 %vm4401_vm0, %v4400_v0 }
 0x44f   :  { %3957 = vmatpush3.msra.mxu1 %v1919_v20 }
 0x450   :  { %3948 = vmatmul.mubr.msk.f32.gmra.mxu0 %vm97_vm1, %v1673_v48  ;;  %4003 = vmatprep.subr.mxu1 %v4400_v0 }
 0x451   :  { %3985 = vmatprep.mubr.msk.f32.mxu0 %vm4401_vm0, %v4400_v0  ;;  %3959 = vmatmul.mubr.msk.f32.vlgmr.msra.gmra.mxu1 %vm97_vm1, %v5008_v34  ;;  %v3307_v34 = vld [vmem:[%s5466_s8 + $0x1] ss:$0 sm:$0xff] }
 0x452   :  { %4004 = vmatpush3.msra.mxu1 %v5100_v8  ;;  %3961 = vmatprep.mubr.msk.f32.mxu1 %vm4401_vm0, %v4400_v0 }
 0x453   :  { %4005 = vmatprep.subr.mxu1 %v4400_v0 }
 0x454   :  { %3986 = vmatmul.mubr.f32.vlgmr.msra.gmra.mxu0 %v4400_v0  ;;  %4006 = vmatpush3.msra.mxu1 %v5108_v57 }
 0x455   :  { %3989 = vmatpush3.msra.mxu0 %v5110_v1  ;;  %4000 = vmatprep.mubr.msk.f32.mxu0 %vm4401_vm0, %v4400_v0 }
 0x456   :  { %3990 = vmatprep.subr.mxu0 %v4400_v0  ;;  %3962 = vmatmul.mubr.msk.f32.gmra.mxu1 %vm97_vm1, %v5026_v40 }
 0x457   :  { %3991 = vmatpush3.msra.mxu0 %v5117_v16  ;;  %3964 = vmatprep.mubr.msk.f32.mxu1 %vm4401_vm0, %v4400_v0 }
 0x458   :  { %3992 = vmatprep.subr.mxu0 %v4400_v0  ;;  %4007 = vmatprep.subr.mxu1 %v4400_v0 }
 0x459   :  { %3993 = vmatpush3.msra.mxu0 %v5124_v17  ;;  %4008 = vmatpush3.msra.mxu1 %v5128_v62 }
 0x45a   :  { %3994 = vmatprep.subr.mxu0 %v4400_v0  ;;  %3965 = vmatmul.mubr.msk.f32.gmra.mxu1 %vm97_vm1, %v5050_v63 }
 0x45b   :  { %3995 = vmatpush3.msra.mxu0 %v5134_v10  ;;  %3967 = vmatprep.mubr.msk.f32.mxu1 %vm4401_vm0, %v4400_v0 }
 0x45c   :  { %3996 = vmatprep.subr.mxu0 %v4400_v0  ;;  %4009 = vmatprep.subr.mxu1 %v4400_v0 }
 0x45d   :  { %3997 = vmatpush3.msra.mxu0 %v5140_v11  ;;  %4010 = vmatpush3.msra.mxu1 %v5144_v14 }
 0x45e   :  { %3998 = vmatprep.subr.mxu0 %v4400_v0  ;;  %3968 = vmatmul.mubr.msk.f32.gmra.mxu1 %vm97_vm1, %v1672_v43 }
 0x45f   :  { %3999 = vmatpush3.msra.mxu0 %v5150_v15  ;;  %3970 = vmatprep.mubr.msk.f32.mxu1 %vm4401_vm0, %v4400_v0 }
 0x460   :  { %4001 = vmatmul.mubr.f32.vlgmr.msra.gmra.mxu0 %v4400_v0  ;;  %4011 = vmatprep.subr.mxu1 %v4400_v0 }
 0x461   :  { %4012 = vmatpush3.msra.mxu1 %v5157_v18  ;;  %4018 = vmatprep.subr.mxu0 %v4400_v0 }
 0x462   :  { %3971 = vmatmul.mubr.msk.f32.gmra.mxu1 %vm97_vm1, %v1673_v48  ;;  %4013 = vmatprep.subr.mxu1 %v4400_v0 }
 0x463   :  { %4014 = vmatpush3.msra.mxu1 %v5164_v21  ;;  %4015 = vmatprep.mubr.msk.f32.mxu1 %vm4401_vm0, %v4400_v0 }
 0x464   :  { %4019 = vmatpush3.msra.mxu0 %v5035_v61  ;;  %4033 = vmatprep.subr.mxu1 %v4400_v0 }
 0x465   :  { %4020 = vmatprep.subr.mxu0 %v4400_v0  ;;  %4030 = vmatprep.mubr.msk.f32.mxu0 %vm4401_vm0, %v4400_v0 }
 0x466   :  { %4016 = vmatmul.mubr.f32.vlgmr.msra.gmra.mxu1 %v4400_v0  ;;  %4021 = vmatpush3.msra.mxu0 %v5042_v53 }
 0x467   :  { %4034 = vmatpush3.msra.mxu1 %v5110_v1  ;;  %4022 = vmatprep.subr.mxu0 %v4400_v0 }
 0x468   :  { %4035 = vmatprep.subr.mxu1 %v4400_v0  ;;  %4023 = vmatpush3.msra.mxu0 %v5053_v60 }
 0x469   :  { %4036 = vmatpush3.msra.mxu1 %v5117_v16  ;;  %4024 = vmatprep.subr.mxu0 %v4400_v0 }
 0x46a   :  { %4037 = vmatprep.subr.mxu1 %v4400_v0  ;;  %4025 = vmatpush3.msra.mxu0 %v5063_v41 }
 0x46b   :  { %4038 = vmatpush3.msra.mxu1 %v5124_v17  ;;  %4026 = vmatprep.subr.mxu0 %v4400_v0 }
 0x46c   :  { %4039 = vmatprep.subr.mxu1 %v4400_v0  ;;  %4027 = vmatpush3.msra.mxu0 %v5072_v3 }
 0x46d   :  { %4040 = vmatpush3.msra.mxu1 %v5134_v10  ;;  %4028 = vmatprep.subr.mxu0 %v4400_v0 }
 0x46e   :  { %4041 = vmatprep.subr.mxu1 %v4400_v0  ;;  %4029 = vmatpush3.msra.mxu0 %v5080_v9 }
 0x46f   :  { %4042 = vmatpush3.msra.mxu1 %v5140_v11  ;;  %4045 = vmatprep.mubr.msk.f32.mxu1 %vm4401_vm0, %v4400_v0 }
 0x470   :  { %4043 = vmatprep.subr.mxu1 %v4400_v0  ;;  %4048 = vmatprep.subr.mxu0 %v4400_v0 }
 0x471   :  { %4044 = vmatpush3.msra.mxu1 %v5150_v15 }
 0x472   :  { %4063 = vmatprep.subr.mxu1 %v4400_v0 }
 0x4ec   :  { %v1496_v26 = vpop.f32.mrf.mxu0  ;;  %v1566_v28 = vpop.f32.mrf.mxu1 }
 0x4ed   :  { %v1640_v29 = vadd.f32 %v1496_v26, %v4774_v45  ;;  %v1647_v30 = vadd.f32 %v1566_v28, %v4770_v19  ;;  %v3305_v19 = vld [vmem:[%s5468_s10] ss:$0 sm:$0xff] }
 0x4ee   :  { %v3873_v32 = vpop.f32.mrf.mxu0  ;;  %v3888_v2 = vpop.f32.mrf.mxu1 }
 0x4ef   :  { %v3297_v33 = vmul.f32 -1.442695, %v1640_v29  ;;  %v3298_v23 = vmul.f32 -1.442695, %v1647_v30 }
 0x4f1   :  { %4249 = vpow2.f32 %v3297_v33 }
 0x4f2   :  { %4251 = vpow2.f32 %v3298_v23 }
 0x4f6   :  { %v1766_v22 = vpop.f32.mrf.mxu1 }
 0x4f8   :  { %v1636_v24 = vpop.f32.mrf.mxu0  ;;  %v3914_v25 = vpop.f32.mrf.mxu1 }
 0x4f9   :  { %v1637_v33 = vadd.f32 %v4790_v13, %v1636_v24 }
 0x4fa   :  { %v3903_v49 = vpop.f32.mrf.mxu0 }
 0x4fc   :  { %v1771_v35 = vpop.f32.mrf.mxu1 }
 0x4fd   :  { %v1772_v5 = vadd.f32 %v3299_v27, %v1771_v35 }
 0x4fe   :  { %v4250_v44 = vpop.eup %4249  ;;  %v3917_v45 = vpop.f32.mrf.mxu1 }
 0x4ff   :  { %v1644_v55 = vadd.f32 1.0, %v4250_v44  ;;  %v5211_v47 = vadd.f32 %v3305_v19, %v1772_v5  ;;  %v4252_v43 = vpop.eup %4251  ;;  %v1767_v45 = vadd.f32 %v3299_v27, %v1766_v22  ;;  %v3316_v22 = vld [vmem:[%s5466_s8 + $0x2] ss:$0 sm:$0xff] }
 0x500   :  { %v1881_v52 = vpop.f32.mrf.mxu0  ;;  %v1651_v30 = vadd.f32 1.0, %v4252_v43 }
 0x501   :  { %4253 = vrcp.f32 %v1644_v55  ;;  %v1797_v13 = vadd.f32 %v3305_v19, %v1767_v45 }
 0x502   :  { %v3937_v4 = vpop.f32.mrf.mxu0  ;;  %v1776_v56 = vpop.f32.mrf.mxu1  ;;  %4255 = vrcp.f32 %v1651_v30  ;;  %v1882_v30 = vadd.f32 %v3307_v34, %v1881_v52 }
 0x503   :  { %v1777_v31 = vadd.f32 %v3299_v27, %v1776_v56 }
 0x504   :  { %v1886_v36 = vpop.f32.mrf.mxu0  ;;  %v3920_v37 = vpop.f32.mrf.mxu1 }
 0x505   :  { %v1887_v39 = vadd.f32 %v3307_v34, %v1886_v36  ;;  %v5216_v46 = vadd.f32 %v3305_v19, %v1777_v31 }
 0x506   :  { %v3940_v40 = vpop.f32.mrf.mxu0 }
 0x507   :  { %v1781_v59 = vpop.f32.mrf.mxu1  ;;  %v5221_v63 = vadd.f32 %v3314_v51, %v1887_v39 }
 0x508   :  { %v1891_v6 = vpop.f32.mrf.mxu0  ;;  %v1782_v48 = vadd.f32 %v3299_v27, %v1781_v59 }
 0x509   :  { %v1892_v20 = vadd.f32 %v3307_v34, %v1891_v6  ;;  %v3923_v26 = vpop.f32.mrf.mxu1 }
 0x50a   :  { %v3943_v28 = vpop.f32.mrf.mxu0  ;;  %v5223_v29 = vadd.f32 %v3305_v19, %v1782_v48 }
 0x50b   :  { %v5225_v32 = vadd.f32 %v3314_v51, %v1892_v20 }
 0x50c   :  { %v1896_v2 = vpop.f32.mrf.mxu0 }
 0x50d   :  { %v1897_v23 = vadd.f32 %v3307_v34, %v1896_v2  ;;  %v1786_v25 = vpop.f32.mrf.mxu1 }
 0x50e   :  { %v4254_v49 = vpop.eup %4253  ;;  %v3946_v35 = vpop.f32.mrf.mxu0  ;;  %v1787_v5 = vadd.f32 %v3299_v27, %v1786_v25  ;;  %v1913_v25 = vadd.f32 %v3314_v51, %v1882_v30 }
 0x50f   :  { %v1654_v44 = vmul.f32 %v4254_v49, %v1637_v33  ;;  %v3926_v55 = vpop.f32.mrf.mxu1  ;;  %v5228_v4 = vadd.f32 %v3314_v51, %v1897_v23 }
 0x510   :  { %v1901_v56 = vpop.f32.mrf.mxu0  ;;  %v5230_v31 = vadd.f32 %v3305_v19, %v1787_v5  ;;  %v4256_v19 = vpop.eup %4255 }
 0x511   :  { %v1655_v36 = vadd.f32 %v1654_v44, %v4785_v7  ;;  %v1902_v37 = vadd.f32 %v3307_v34, %v1901_v56  ;;  %v1997_v39 = vpop.f32.mrf.mxu1  ;;  %v1657_v35 = vsub.f32 1.0, %v4256_v19 }
 0x512   :  { %v3949_v40 = vpop.f32.mrf.mxu0 }
 0x513   :  { %4257 = vtanh.f32 %v1655_v36  ;;  %v3960_v24 = vpop.f32.mrf.mxu1  ;;  %v5233_v59 = vadd.f32 %v3314_v51, %v1902_v37  ;;  %v1659_v36 = vmul.f32 %v4256_v19, %v4985_v50  ;;  %v1998_v19 = vadd.f32 %v3316_v22, %v1997_v39 }
 0x514   :  { %v2115_v43 = vpop.f32.mrf.mxu0 }
 0x515   :  { %v2259_v6 = vadd.f32 %v2115_v43, %v1797_v13 }
 0x516   :  { %v3987_v48 = vpop.f32.mrf.mxu0  ;;  %v2002_v27 = vpop.f32.mrf.mxu1 }
 0x517   :  { %v3324_v20 = vmul.f32 -1.442695, %v2259_v6  ;;  %v5238_v26 = vadd.f32 %v3316_v22, %v2002_v27  ;;  %v5252_v27 = vld [vmem:[%s5468_s10 + $0x2] ss:$0 sm:$0xff]  ;;  %s4403_s10 = smov [#allocation8]  }
 0x518   :  { %v3963_v7 = vpop.f32.mrf.mxu1  ;;  %s3230_s16 = sshll.u32 %s4403_s10, 4  ;;  %s3231_s16 = int_to_ptr.vmem [resolvable:$true] %s3230_s16 }
 0x519   :  { %4259 = vpow2.f32 %v3324_v20  ;;  %s4369_s17 = scalar_lea.vmem %s3231_s16, 128  ;;  %p4374_p2 = scmp.lt.s32.totalorder %s3231_s16, %s3231_s16 }
 0x51a   :  { %v2007_v28 = vpop.f32.mrf.mxu1  ;;  %p4370_p1 = scmp.ne.s32.totalorder %s3231_s16, %s4369_s17  ;;  %p4375_p3 = scmp.lt.s32.totalorder %s4369_s17, %s4369_s17 }
 0x51b   :  { %v5240_v2 = vadd.f32 %v3316_v22, %v2007_v28 }
 0x51c   :  { %v3966_v33 = vpop.f32.mrf.mxu1  ;;  %p4376_p4 = por %p4375_p3, %p4374_p2 }
 0x51e   :  { %v2012_v23 = vpop.f32.mrf.mxu1  ;;  %p4377_p5 = pnand %p4376_p4, %p4370_p1 }
 0x51f   :  { %v5242_v49 = vadd.f32 %v3316_v22, %v2012_v23 }
 0x520   :  { %v4258_v5 = vpop.eup %4257  ;;  %v2185_v44 = vpop.f32.mrf.mxu0 }
 0x521   :  { %v3969_v45 = vpop.f32.mrf.mxu1  ;;  %v2266_v55 = vadd.f32 %v2185_v44, %v1913_v25  ;;  %v1658_v56 = vmul.f32 %v4258_v5, %v1657_v35 }
 0x522   :  { %v4002_v37 = vpop.f32.mrf.mxu0 }
 0x523   :  { %v2017_v40 = vpop.f32.mrf.mxu1  ;;  %v3325_v13 = vmul.f32 -1.442695, %v2266_v55  ;;  %v5247_v34 = vadd.f32 %v1659_v36, %v1658_v56 }
 0x524   :  { %v5245_v52 = vadd.f32 %v3316_v22, %v2017_v40 }
 0x525   :  { %v3972_v24 = vpop.f32.mrf.mxu1  ;;  %4261 = vpow2.f32 %v3325_v13 }
 0x526   :  { %v4260_v51 = vpop.eup %4259 }
 0x527   :  { %v2255_v43 = vpop.f32.mrf.mxu1  ;;  %v2263_v6 = vadd.f32 1.0, %v4260_v51 }
 0x528   :  { %v2256_v28 = vadd.f32 %v5252_v27, %v2255_v43 }
 0x529   :  { %v4017_v48 = vpop.f32.mrf.mxu1  ;;  %4263 = vrcp.f32 %v2263_v6 }
 0x532   :  { %v4262_v20 = vpop.eup %4261 }
 0x533   :  { %v2270_v7 = vadd.f32 1.0, %v4262_v20 }
 0x535   :  { %4265 = vrcp.f32 %v2270_v7 }
 0x536   :  { %v4264_v30 = vpop.eup %4263 }
 0x537   :  { %v2273_v33 = vmul.f32 %v4264_v30, %v2256_v28 }
 0x539   :  { %v2274_v23 = vadd.f32 %v2273_v33, %v1998_v19 }
 0x53b   :  { %4267 = vtanh.f32 %v2274_v23 }
 0x542   :  { %v4266_v25 = vpop.eup %4265 }
 0x543   :  { %v2276_v35 = vsub.f32 1.0, %v4266_v25  ;;  %v2278_v45 = vmul.f32 0.0, %v4266_v25 }
 0x548   :  { %v4268_v5 = vpop.eup %4267 }
 0x549   :  { %v2277_v44 = vmul.f32 %v4268_v5, %v2276_v35 }
 0x54b   :  { %v2279_v55 = vadd.f32 %v2278_v45, %v2277_v44 }
 0x54d   :  { %v5257_v56 = vsel %vm702_vm5, %v2279_v55, 0.0 }
 0x54e   :  { %4031 = vmatmul.mubr.msk.f32.vlgmr.msra.gmra.mxu0 %vm462_vm6, %v5257_v56  ;;  %4046 = vmatmul.mubr.msk.f32.vlgmr.msra.gmra.mxu1 %vm462_vm6, %v5257_v56 }
 0x54f   :  { %4049 = vmatpush3.msra.mxu0 %v5100_v8  ;;  %4060 = vmatprep.mubr.msk.f32.mxu0 %vm4401_vm0, %v4400_v0 }
 0x550   :  { %4050 = vmatprep.subr.mxu0 %v4400_v0  ;;  %4064 = vmatpush3.msra.mxu1 %v5035_v61 }
 0x551   :  { %4051 = vmatpush3.msra.mxu0 %v5108_v57  ;;  %4065 = vmatprep.subr.mxu1 %v4400_v0 }
 0x552   :  { %4052 = vmatprep.subr.mxu0 %v4400_v0  ;;  %4066 = vmatpush3.msra.mxu1 %v5042_v53 }
 0x553   :  { %4053 = vmatpush3.msra.mxu0 %v5128_v62  ;;  %4067 = vmatprep.subr.mxu1 %v4400_v0 }
 0x554   :  { %4054 = vmatprep.subr.mxu0 %v4400_v0  ;;  %4068 = vmatpush3.msra.mxu1 %v5053_v60 }
 0x555   :  { %4055 = vmatpush3.msra.mxu0 %v5144_v14  ;;  %4069 = vmatprep.subr.mxu1 %v4400_v0 }
 0x556   :  { %4056 = vmatprep.subr.mxu0 %v4400_v0  ;;  %4070 = vmatpush3.msra.mxu1 %v5063_v41 }
 0x557   :  { %4057 = vmatpush3.msra.mxu0 %v5157_v18  ;;  %4071 = vmatprep.subr.mxu1 %v4400_v0 }
 0x558   :  { %4058 = vmatprep.subr.mxu0 %v4400_v0  ;;  %4072 = vmatpush3.msra.mxu1 %v5072_v3 }
 0x559   :  { %4059 = vmatpush3.msra.mxu0 %v5164_v21  ;;  %4073 = vmatprep.subr.mxu1 %v4400_v0 }
 0x55a   :  { %4061 = vmatmul.mubr.msk.f32.vlgmr.msra.gmra.mxu0 %vm462_vm6, %v5257_v56  ;;  %4078 = vmatprep.subr.mxu0 %v4400_v0 }
 0x55b   :  { %4079 = vmatpush3.msra.mxu0 %v5110_v1  ;;  %4074 = vmatpush3.msra.mxu1 %v5080_v9 }
 0x55c   :  { %4080 = vmatprep.subr.mxu0 %v4400_v0  ;;  %4075 = vmatprep.mubr.msk.f32.mxu1 %vm4401_vm0, %v4400_v0 }
 0x55d   :  { %4081 = vmatpush3.msra.mxu0 %v5117_v16  ;;  %4090 = vmatprep.mubr.msk.f32.mxu0 %vm4401_vm0, %v4400_v0 }
 0x55e   :  { %4082 = vmatprep.subr.mxu0 %v4400_v0  ;;  %4093 = vmatprep.subr.mxu1 %v4400_v0 }
 0x55f   :  { %4083 = vmatpush3.msra.mxu0 %v5124_v17 }
 0x560   :  { %4084 = vmatprep.subr.mxu0 %v4400_v0 }
 0x561   :  { %4085 = vmatpush3.msra.mxu0 %v5134_v10 }
 0x562   :  { %4086 = vmatprep.subr.mxu0 %v4400_v0 }
 0x563   :  { %4087 = vmatpush3.msra.mxu0 %v5140_v11 }
 0x564   :  { %4088 = vmatprep.subr.mxu0 %v4400_v0 }
 0x565   :  { %4089 = vmatpush3.msra.mxu0 %v5150_v15 }
 0x566   :  { %4108 = vmatprep.subr.mxu0 %v4400_v0 }
 0x60e   :  { %v2350_v54 = vpop.f32.mrf.mxu0  ;;  %v2420_v39 = vpop.f32.mrf.mxu1 }
 0x60f   :  { %v2494_v22 = vadd.f32 %v2350_v54, %v5211_v47  ;;  %v2501_v13 = vadd.f32 %v2420_v39, %v5221_v63 }
 0x610   :  { %v4032_v36 = vpop.f32.mrf.mxu0  ;;  %v4047_v37 = vpop.f32.mrf.mxu1 }
 0x611   :  { %v3329_v40 = vmul.f32 -1.442695, %v2494_v22  ;;  %v3330_v24 = vmul.f32 -1.442695, %v2501_v13 }
 0x613   :  { %4269 = vpow2.f32 %v3329_v40 }
 0x614   :  { %4271 = vpow2.f32 %v3330_v24 }
 0x61a   :  { %v2490_v51 = vpop.f32.mrf.mxu0 }
 0x61b   :  { %v2491_v28 = vadd.f32 %v5252_v27, %v2490_v51 }
 0x61c   :  { %v4062_v43 = vpop.f32.mrf.mxu0 }
 0x620   :  { %v4270_v6 = vpop.eup %4269 }
 0x621   :  { %v2498_v48 = vadd.f32 1.0, %v4270_v6  ;;  %v4272_v20 = vpop.eup %4271 }
 0x622   :  { %v2505_v7 = vadd.f32 1.0, %v4272_v20 }
 0x623   :  { %4273 = vrcp.f32 %v2498_v48 }
 0x624   :  { %4275 = vrcp.f32 %v2505_v7 }
 0x630   :  { %v4274_v30 = vpop.eup %4273 }
 0x631   :  { %v2508_v47 = vmul.f32 %v4274_v30, %v2491_v28  ;;  %v4276_v33 = vpop.eup %4275 }
 0x632   :  { %v2511_v23 = vsub.f32 1.0, %v4276_v33  ;;  %v2513_v35 = vmul.f32 %v4276_v33, %v5257_v56 }
 0x633   :  { %v2509_v19 = vadd.f32 %v2508_v47, %v5238_v26 }
 0x635   :  { %4277 = vtanh.f32 %v2509_v19 }
 0x642   :  { %v4278_v63 = vpop.eup %4277 }
 0x643   :  { %v2512_v25 = vmul.f32 %v4278_v63, %v2511_v23 }
 0x645   :  { %v2514_v5 = vadd.f32 %v2513_v35, %v2512_v25 }
 0x647   :  { %v5315_v44 = vsel %vm943_vm9, %v2514_v5, %v5257_v56 }
 0x648   :  { %4076 = vmatmul.mubr.msk.f32.vlgmr.msra.gmra.mxu1 %vm462_vm6, %v5315_v44  ;;  %4091 = vmatmul.mubr.msk.f32.vlgmr.msra.gmra.mxu0 %vm462_vm6, %v5315_v44 }
 0x649   :  { %4094 = vmatpush3.msra.mxu1 %v5100_v8  ;;  %4105 = vmatprep.mubr.msk.f32.mxu1 %vm4401_vm0, %v4400_v0 }
 0x64a   :  { %4095 = vmatprep.subr.mxu1 %v4400_v0  ;;  %4109 = vmatpush3.msra.mxu0 %v5035_v61 }
 0x64b   :  { %4096 = vmatpush3.msra.mxu1 %v5108_v57  ;;  %4110 = vmatprep.subr.mxu0 %v4400_v0 }
 0x64c   :  { %4097 = vmatprep.subr.mxu1 %v4400_v0  ;;  %4111 = vmatpush3.msra.mxu0 %v5042_v53 }
 0x64d   :  { %4098 = vmatpush3.msra.mxu1 %v5128_v62  ;;  %4112 = vmatprep.subr.mxu0 %v4400_v0 }
 0x64e   :  { %4099 = vmatprep.subr.mxu1 %v4400_v0  ;;  %4113 = vmatpush3.msra.mxu0 %v5053_v60 }
 0x64f   :  { %4100 = vmatpush3.msra.mxu1 %v5144_v14  ;;  %4114 = vmatprep.subr.mxu0 %v4400_v0 }
 0x650   :  { %4101 = vmatprep.subr.mxu1 %v4400_v0  ;;  %4115 = vmatpush3.msra.mxu0 %v5063_v41 }
 0x651   :  { %4102 = vmatpush3.msra.mxu1 %v5157_v18  ;;  %4116 = vmatprep.subr.mxu0 %v4400_v0 }
 0x652   :  { %4103 = vmatprep.subr.mxu1 %v4400_v0  ;;  %4117 = vmatpush3.msra.mxu0 %v5072_v3 }
 0x653   :  { %4104 = vmatpush3.msra.mxu1 %v5164_v21  ;;  %4118 = vmatprep.subr.mxu0 %v4400_v0 }
 0x654   :  { %4106 = vmatmul.mubr.msk.f32.vlgmr.msra.gmra.mxu1 %vm462_vm6, %v5315_v44  ;;  %4123 = vmatprep.subr.mxu1 %v4400_v0 }
 0x655   :  { %4124 = vmatpush3.msra.mxu1 %v5110_v1  ;;  %4119 = vmatpush3.msra.mxu0 %v5080_v9 }
 0x656   :  { %4125 = vmatprep.subr.mxu1 %v4400_v0  ;;  %4120 = vmatprep.mubr.msk.f32.mxu0 %vm4401_vm0, %v4400_v0 }
 0x657   :  { %4126 = vmatpush3.msra.mxu1 %v5117_v16  ;;  %4135 = vmatprep.mubr.msk.f32.mxu1 %vm4401_vm0, %v4400_v0 }
 0x658   :  { %4127 = vmatprep.subr.mxu1 %v4400_v0  ;;  %4138 = vmatprep.subr.mxu0 %v4400_v0 }
 0x659   :  { %4128 = vmatpush3.msra.mxu1 %v5124_v17 }
 0x65a   :  { %4129 = vmatprep.subr.mxu1 %v4400_v0 }
 0x65b   :  { %4130 = vmatpush3.msra.mxu1 %v5134_v10 }
 0x65c   :  { %4131 = vmatprep.subr.mxu1 %v4400_v0 }
 0x65d   :  { %4132 = vmatpush3.msra.mxu1 %v5140_v11 }
 0x65e   :  { %4133 = vmatprep.subr.mxu1 %v4400_v0 }
 0x65f   :  { %4134 = vmatpush3.msra.mxu1 %v5150_v15 }
 0x660   :  { %4153 = vmatprep.subr.mxu1 %v4400_v0 }
 0x708   :  { %v2585_v38 = vpop.f32.mrf.mxu1  ;;  %v2655_v26 = vpop.f32.mrf.mxu0 }
 0x709   :  { %v2729_v45 = vadd.f32 %v2585_v38, %v5216_v46  ;;  %v2736_v22 = vadd.f32 %v2655_v26, %v5225_v32 }
 0x70a   :  { %v4077_v55 = vpop.f32.mrf.mxu1  ;;  %v4092_v54 = vpop.f32.mrf.mxu0 }
 0x70b   :  { %v3334_v39 = vmul.f32 -1.442695, %v2729_v45  ;;  %v3335_v36 = vmul.f32 -1.442695, %v2736_v22 }
 0x70d   :  { %4279 = vpow2.f32 %v3334_v39 }
 0x70e   :  { %4281 = vpow2.f32 %v3335_v36 }
 0x714   :  { %v2725_v37 = vpop.f32.mrf.mxu1 }
 0x715   :  { %v2726_v6 = vadd.f32 %v5252_v27, %v2725_v37 }
 0x716   :  { %v4107_v40 = vpop.f32.mrf.mxu1 }
 0x71a   :  { %v4280_v13 = vpop.eup %4279 }
 0x71b   :  { %v2733_v24 = vadd.f32 1.0, %v4280_v13  ;;  %v4282_v51 = vpop.eup %4281 }
 0x71c   :  { %v2740_v43 = vadd.f32 1.0, %v4282_v51  ;;  %v1665_v51 = vpop.permute.xlu0 %1664 }
 0x71d   :  { %4283 = vrcp.f32 %v2733_v24  ;;  %vm1666_vm12 = vcmp.eq.s32.totalorder %v1665_v51, 1 }
 0x71e   :  { %4285 = vrcp.f32 %v2740_v43 }
 0x72a   :  { %v4284_v48 = vpop.eup %4283 }
 0x72b   :  { %v2743_v46 = vmul.f32 %v4284_v48, %v2726_v6  ;;  %v4286_v7 = vpop.eup %4285 }
 0x72c   :  { %v2746_v28 = vsub.f32 1.0, %v4286_v7  ;;  %v2748_v47 = vmul.f32 %v4286_v7, %v5315_v44 }
 0x72d   :  { %v2744_v20 = vadd.f32 %v2743_v46, %v5240_v2  ;;  %v1667_v46 = vsel %vm1666_vm12, %v5247_v34, %v4985_v50 }
 0x72f   :  { %4287 = vtanh.f32 %v2744_v20 }
 0x73c   :  { %v4288_v32 = vpop.eup %4287 }
 0x73d   :  { %v2747_v30 = vmul.f32 %v4288_v32, %v2746_v28 }
 0x73f   :  { %v2749_v19 = vadd.f32 %v2748_v47, %v2747_v30 }
 0x741   :  { %v5373_v33 = vsel %vm1184_vm10, %v2749_v19, %v5315_v44 }
 0x742   :  { %4121 = vmatmul.mubr.msk.f32.vlgmr.msra.gmra.mxu0 %vm462_vm6, %v5373_v33  ;;  %4136 = vmatmul.mubr.msk.f32.vlgmr.msra.gmra.mxu1 %vm462_vm6, %v5373_v33 }
 0x743   :  { %4139 = vmatpush3.msra.mxu0 %v5100_v8  ;;  %4150 = vmatprep.mubr.msk.f32.mxu0 %vm4401_vm0, %v4400_v0 }
 0x744   :  { %4140 = vmatprep.subr.mxu0 %v4400_v0  ;;  %4154 = vmatpush3.msra.mxu1 %v5035_v61 }
 0x745   :  { %4141 = vmatpush3.msra.mxu0 %v5108_v57  ;;  %4155 = vmatprep.subr.mxu1 %v4400_v0 }
 0x746   :  { %4142 = vmatprep.subr.mxu0 %v4400_v0  ;;  %4156 = vmatpush3.msra.mxu1 %v5042_v53 }
 0x747   :  { %4143 = vmatpush3.msra.mxu0 %v5128_v62  ;;  %4157 = vmatprep.subr.mxu1 %v4400_v0 }
 0x748   :  { %4144 = vmatprep.subr.mxu0 %v4400_v0  ;;  %4158 = vmatpush3.msra.mxu1 %v5053_v60 }
 0x749   :  { %4145 = vmatpush3.msra.mxu0 %v5144_v14  ;;  %4159 = vmatprep.subr.mxu1 %v4400_v0 }
 0x74a   :  { %4146 = vmatprep.subr.mxu0 %v4400_v0  ;;  %4160 = vmatpush3.msra.mxu1 %v5063_v41 }
 0x74b   :  { %4147 = vmatpush3.msra.mxu0 %v5157_v18  ;;  %4161 = vmatprep.subr.mxu1 %v4400_v0 }
 0x74c   :  { %4148 = vmatprep.subr.mxu0 %v4400_v0  ;;  %4162 = vmatpush3.msra.mxu1 %v5072_v3 }
 0x74d   :  { %4149 = vmatpush3.msra.mxu0 %v5164_v21  ;;  %4163 = vmatprep.subr.mxu1 %v4400_v0 }
 0x74e   :  { %4151 = vmatmul.mubr.msk.f32.vlgmr.msra.gmra.mxu0 %vm462_vm6, %v5373_v33  ;;  %4168 = vmatprep.subr.mxu0 %v4400_v0 }
 0x74f   :  { %4169 = vmatpush3.msra.mxu0 %v5110_v1  ;;  %4164 = vmatpush3.msra.mxu1 %v5080_v9 }
 0x750   :  { %4170 = vmatprep.subr.mxu0 %v4400_v0  ;;  %4165 = vmatprep.mubr.msk.f32.mxu1 %vm4401_vm0, %v4400_v0 }
 0x751   :  { %4171 = vmatpush3.msra.mxu0 %v5117_v16  ;;  %4180 = vmatprep.mubr.msk.f32.mxu0 %vm4401_vm0, %v4400_v0 }
 0x752   :  { %4172 = vmatprep.subr.mxu0 %v4400_v0  ;;  %4183 = vmatprep.subr.mxu1 %v4400_v0 }
 0x753   :  { %4173 = vmatpush3.msra.mxu0 %v5124_v17 }
 0x754   :  { %4174 = vmatprep.subr.mxu0 %v4400_v0 }
 0x755   :  { %4175 = vmatpush3.msra.mxu0 %v5134_v10 }
 0x756   :  { %4176 = vmatprep.subr.mxu0 %v4400_v0 }
 0x757   :  { %4177 = vmatpush3.msra.mxu0 %v5140_v11 }
 0x758   :  { %4178 = vmatprep.subr.mxu0 %v4400_v0 }
 0x759   :  { %4179 = vmatpush3.msra.mxu0 %v5150_v15 }
 0x802   :  { %v2820_v12 = vpop.f32.mrf.mxu0  ;;  %v2890_v61 = vpop.f32.mrf.mxu1 }
 0x803   :  { %v2964_v53 = vadd.f32 %v2820_v12, %v5223_v29  ;;  %v2971_v9 = vadd.f32 %v2890_v61, %v5228_v4 }
 0x804   :  { %v4122_v60 = vpop.f32.mrf.mxu0  ;;  %v4137_v41 = vpop.f32.mrf.mxu1 }
 0x805   :  { %v3339_v3 = vmul.f32 -1.442695, %v2964_v53  ;;  %v3340_v1 = vmul.f32 -1.442695, %v2971_v9 }
 0x807   :  { %4289 = vpow2.f32 %v3339_v3 }
 0x808   :  { %4291 = vpow2.f32 %v3340_v1 }
 0x80e   :  { %v2960_v16 = vpop.f32.mrf.mxu0 }
 0x80f   :  { %v2961_v15 = vadd.f32 %v5252_v27, %v2960_v16 }
 0x810   :  { %v4152_v17 = vpop.f32.mrf.mxu0 }
 0x814   :  { %v4290_v10 = vpop.eup %4289 }
 0x815   :  { %v2968_v11 = vadd.f32 1.0, %v4290_v10  ;;  %v4292_v2 = vpop.eup %4291 }
 0x816   :  { %v2975_v23 = vadd.f32 1.0, %v4292_v2 }
 0x817   :  { %4293 = vrcp.f32 %v2968_v11 }
 0x818   :  { %4295 = vrcp.f32 %v2975_v23 }
 0x824   :  { %v4294_v63 = vpop.eup %4293 }
 0x825   :  { %v2978_v29 = vmul.f32 %v4294_v63, %v2961_v15  ;;  %v4296_v35 = vpop.eup %4295 }
 0x826   :  { %v2981_v5 = vsub.f32 1.0, %v4296_v35  ;;  %v2983_v38 = vmul.f32 %v4296_v35, %v5373_v33 }
 0x827   :  { %v2979_v25 = vadd.f32 %v2978_v29, %v5242_v49 }
 0x829   :  { %4297 = vtanh.f32 %v2979_v25 }
 0x836   :  { %v4298_v4 = vpop.eup %4297 }
 0x837   :  { %v2982_v44 = vmul.f32 %v4298_v4, %v2981_v5 }
 0x839   :  { %v2984_v26 = vadd.f32 %v2983_v38, %v2982_v44 }
 0x83b   :  { %v2985_v45 = vsel %vm1425_vm11, %v2984_v26, %v5373_v33 }
 0x83c   :  { %4166 = vmatmul.mubr.msk.f32.vlgmr.msra.gmra.mxu1 %vm462_vm6, %v2985_v45  ;;  %4181 = vmatmul.mubr.msk.f32.vlgmr.msra.gmra.mxu0 %vm462_vm6, %v2985_v45 }
 0x83d   :  { %4184 = vmatpush3.msra.mxu1 %v5100_v8  ;;  %4195 = vmatprep.mubr.msk.f32.mxu1 %vm4401_vm0, %v4400_v0 }
 0x83e   :  { %4185 = vmatprep.subr.mxu1 %v4400_v0 }
 0x83f   :  { %4186 = vmatpush3.msra.mxu1 %v5108_v57 }
 0x840   :  { %4187 = vmatprep.subr.mxu1 %v4400_v0 }
 0x841   :  { %4188 = vmatpush3.msra.mxu1 %v5128_v62 }
 0x842   :  { %4189 = vmatprep.subr.mxu1 %v4400_v0 }
 0x843   :  { %4190 = vmatpush3.msra.mxu1 %v5144_v14 }
 0x844   :  { %4191 = vmatprep.subr.mxu1 %v4400_v0 }
 0x845   :  { %4192 = vmatpush3.msra.mxu1 %v5157_v18 }
 0x846   :  { %4193 = vmatprep.subr.mxu1 %v4400_v0 }
 0x847   :  { %4194 = vmatpush3.msra.mxu1 %v5164_v21 }
 0x848   :  { %4196 = vmatmul.mubr.msk.f32.vlgmr.msra.gmra.mxu1 %vm462_vm6, %v2985_v45 }
 0x8fc   :  { %v3055_v42 = vpop.f32.mrf.mxu1  ;;  %v3125_v8 = vpop.f32.mrf.mxu0 }
 0x8fd   :  { %v3199_v57 = vadd.f32 %v3055_v42, %v5230_v31  ;;  %v3206_v14 = vadd.f32 %v3125_v8, %v5233_v59 }
 0x8fe   :  { %v4167_v49 = vpop.f32.mrf.mxu1  ;;  %v4182_v62 = vpop.f32.mrf.mxu0 }
 0x8ff   :  { %v3344_v55 = vmul.f32 -1.442695, %v3199_v57  ;;  %v3345_v54 = vmul.f32 -1.442695, %v3206_v14 }
 0x901   :  { %4299 = vpow2.f32 %v3344_v55 }
 0x902   :  { %4301 = vpow2.f32 %v3345_v54 }
 0x908   :  { %v3195_v39 = vpop.f32.mrf.mxu1 }
 0x909   :  { %v3196_v37 = vadd.f32 %v5252_v27, %v3195_v39  ;;  %v1668_v27 = vadd.f32 %v1667_v46, %v4798_v58 }
 0x90a   :  { %v4197_v22 = vpop.f32.mrf.mxu1 }
 0x90e   :  { %v4300_v18 = vpop.eup %4299 }
 0x90f   :  { %v3203_v0 = vadd.f32 1.0, %v4300_v18  ;;  %v4302_v21 = vpop.eup %4301 }
 0x910   :  { %v3210_v36 = vadd.f32 1.0, %v4302_v21 }
 0x911   :  { %4303 = vrcp.f32 %v3203_v0 }
 0x912   :  { %4305 = vrcp.f32 %v3210_v36 }
 0x91e   :  { %v4304_v40 = vpop.eup %4303 }
 0x91f   :  { %v3213_v31 = vmul.f32 %v4304_v40, %v3196_v37  ;;  %v4306_v24 = vpop.eup %4305 }
 0x920   :  { %v3216_v59 = vsub.f32 1.0, %v4306_v24  ;;  %v3218_v48 = vmul.f32 %v4306_v24, %v2985_v45 }
 0x921   :  { %v3214_v13 = vadd.f32 %v3213_v31, %v5245_v52 }
 0x923   :  { %4307 = vtanh.f32 %v3214_v13 }
 0x930   :  { %v4308_v43 = vpop.eup %4307 }
 0x931   :  { %v3217_v6 = vmul.f32 %v4308_v43, %v3216_v59 }
 0x933   :  { %v3219_v20 = vadd.f32 %v3218_v48, %v3217_v6 }
 0x935   :  { %v3220_v7 = vsel %vm1666_vm12, %v3219_v20, %v2985_v45 }
 0x936   :  { %v3221_v28 = vadd.f32 %v3220_v7, %v5257_v56 }
 0x938   :  { %v3222_v52 = vadd.f32 %v3221_v28, %v1668_v27 }
 0x93a   :  { %3223 = vst.msk [vmem:[#allocation8] sm:$0xff] %vm462_vm6, %v3222_v52 }
 0x93b   :  { %4380 = shalt.err (!%p4377_p5)
}
 0x93c   :  { %3233 = dma.vmem_to_hbm [thread:$0]  %s3231_s16, 128, %s5469_s11, [#allocation4]  }
 0x93d   :  { %4393 = dma.done.wait [#allocation4], 128  }
 0x93e   :  { %4394 = vsyncadd [#allocation4], 4294967168 }
 0x93f   :  { %3237 = vsyncpa [#allocation3], 1 }
 0x940   :  { %3238 = vsyncpa [#allocation6], 1 }
 0x941   :  { %3239 = vsyncpa [#allocation4], 1 }

</bundles_post_ra>
